<compile_context>
chip_gen: v7x
topology: tpu7x:2x2x1
jax: 0.10.0
libtpu: 0.0.40
codegen_flags: <defaults>
</compile_context>

<pallas_src>
import jax
import jax.numpy as jnp
from jax.experimental import pallas as pl
from jax.experimental.pallas import tpu as pltpu


def _largest_divisor(n, cap, multiple_of=1):
    d = min(n, cap)
    while d >= multiple_of:
        if n % d == 0 and d % multiple_of == 0:
            return d
        d -= 1
    return n  # fall back to the full dim (always a legal block size)


# ---------------- pass 1: im2col-free conv + partial BN stats ----------------
def conv_stats_kernel(x_ref, w_ref, conv_ref, stats_ref):
    # x_ref:     (1, TH+2, W+2, Cin)  bf16  row tile of zero-padded input (halo)
    # w_ref:     (9, Cin, CoutP)      bf16  3x3 taps, resident in VMEM
    # conv_ref:  (1, TH*W, CoutP)     f32   un-normalized conv rows
    # stats_ref: (1, 2, CoutP)        f32   per-tile [sum; sum-of-squares]
    TH = x_ref.shape[1] - 2
    W = x_ref.shape[2] - 2
    Cin = x_ref.shape[3]
    CoutP = w_ref.shape[2]

    acc = jnp.zeros((TH * W, CoutP), dtype=jnp.float32)
    for t in range(9):  # static unroll: 9 accumulated MXU matmuls
        ky, kx = divmod(t, 3)
        tap = x_ref[0, ky:ky + TH, kx:kx + W, :].reshape(TH * W, Cin)
        acc = acc + jnp.dot(tap, w_ref[t], preferred_element_type=jnp.float32)

    conv_ref[0] = acc
    s1 = jnp.sum(acc, axis=0, keepdims=True)          # (1, CoutP)
    s2 = jnp.sum(acc * acc, axis=0, keepdims=True)    # (1, CoutP)
    stats_ref[0] = jnp.concatenate([s1, s2], axis=0)  # (2, CoutP)


# ---------------- pass 2: folded BN + ReLU (in place) ----------------
def bn_relu_kernel(conv_ref, scale_ref, shift_ref, o_ref):
    y = conv_ref[...] * scale_ref[...] + shift_ref[...]
    o_ref[...] = jnp.maximum(y, 0.0)


def conv_norm_act(x_nchw, w_oihw, gamma, beta, eps=1e-5, row_tile_h=8):
    """ConvNormAct forward. x_nchw: (N, Cin, H, W) f32 -> (N, Cout, H, W) f32."""
    N, Cin, H, W = x_nchw.shape
    Cout, Cin_w, KH, KW = w_oihw.shape
    assert Cin_w == Cin and KH == 3 and KW == 3

    CoutP = ((Cout + 127) // 128) * 128        # lane-dense channel padding
    TH = _largest_divisor(H, row_tile_h)       # output-row tile height
    nht = H // TH
    T = N * nht                                # number of row tiles (grid size)
    RT = TH * W                                # conv output rows per tile
    R = N * H * W                              # BN reduction size
    Wp2 = W + 2

    # --- glue: NCHW -> NHWC (bf16), zero pad, gather row tiles with 2-row halo ---
    x = jnp.transpose(x_nchw, (0, 2, 3, 1)).astype(jnp.bfloat16)
    xpad = jnp.pad(x, ((0, 0), (1, 1), (1, 1), (0, 0)))        # (N, H+2, W+2, Cin)
    tiles = [xpad[:, ht * TH: ht * TH + TH + 2] for ht in range(nht)]
    x_tiles = jnp.stack(tiles, axis=1).reshape(T, TH + 2, Wp2, Cin)

    # weight (O, I, KH, KW) -> (KH*KW, I, CoutP) bf16, zero-padded channels
    wk = jnp.transpose(w_oihw, (2, 3, 1, 0)).reshape(KH * KW, Cin, Cout)
    wmat = jnp.zeros((KH * KW, Cin, CoutP), jnp.float32).at[..., :Cout].set(wk)
    wmat = wmat.astype(jnp.bfloat16)

    # --- pass 1: conv + per-tile partial stats (parallel grid) ---
    conv_out, stats = pl.pallas_call(
        conv_stats_kernel,
        out_shape=(jax.ShapeDtypeStruct((T, RT, CoutP), jnp.float32),
                   jax.ShapeDtypeStruct((T, 2, CoutP), jnp.float32)),
        grid=(T,),
        in_specs=[
            pl.BlockSpec((1, TH + 2, Wp2, Cin), lambda i: (i, 0, 0, 0)),
            pl.BlockSpec((KH * KW, Cin, CoutP), lambda i: (0, 0, 0)),
        ],
        out_specs=(
            pl.BlockSpec((1, RT, CoutP), lambda i: (i, 0, 0)),
            pl.BlockSpec((1, 2, CoutP), lambda i: (i, 0, 0)),
        ),
        compiler_params=pltpu.CompilerParams(dimension_semantics=("parallel",)),
    )(x_tiles, wmat)

    # --- tiny per-channel glue: combine partials, fold BN affine into scale/shift ---
    gamma_p = jnp.zeros((CoutP,), jnp.float32).at[:Cout].set(gamma.astype(jnp.float32))
    beta_p = jnp.zeros((CoutP,), jnp.float32).at[:Cout].set(beta.astype(jnp.float32))
    total = jnp.sum(stats, axis=0)                              # (2, CoutP)
    mean = total[0] / R
    var = jnp.maximum(total[1] / R - mean * mean, 0.0)          # biased var (BN training)
    scale = gamma_p * jax.lax.rsqrt(var + eps)
    shift = beta_p - mean * scale

    # --- pass 2: normalize + ReLU, in place (aliased), parallel grid ---
    conv_flat = conv_out.reshape(R, CoutP)
    TR = _largest_divisor(R, 1024, multiple_of=8)
    out_flat = pl.pallas_call(
        bn_relu_kernel,
        out_shape=jax.ShapeDtypeStruct((R, CoutP), jnp.float32),
        grid=(R // TR,),
        in_specs=[
            pl.BlockSpec((TR, CoutP), lambda i: (i, 0)),
            pl.BlockSpec((1, CoutP), lambda i: (0, 0)),
            pl.BlockSpec((1, CoutP), lambda i: (0, 0)),
        ],
        out_specs=pl.BlockSpec((TR, CoutP), lambda i: (i, 0)),
        input_output_aliases={0: 0},
        compiler_params=pltpu.CompilerParams(dimension_semantics=("parallel",)),
    )(conv_flat, scale.reshape(1, CoutP), shift.reshape(1, CoutP))

    out = out_flat.reshape(N, H, W, CoutP)[..., :Cout]
    return jnp.transpose(out, (0, 3, 1, 2))


def _reference(x_nchw, w_oihw, gamma, beta, eps=1e-5):
    conv = jax.lax.conv_general_dilated(
        x_nchw, w_oihw, window_strides=(1, 1), padding=((1, 1), (1, 1)),
        dimension_numbers=("NCHW", "OIHW", "NCHW"))
    mean = conv.mean(axis=(0, 2, 3), keepdims=True)
    var = ((conv - mean) ** 2).mean(axis=(0, 2, 3), keepdims=True)  # biased, as BN uses
    y = (conv - mean) / jnp.sqrt(var + eps)
    y = y * gamma.reshape(1, -1, 1, 1) + beta.reshape(1, -1, 1, 1)
    return jnp.maximum(y, 0.0)


if __name__ == "__main__":
    # TODO(synk): spectral-norm ('sn') and up/down-sampling modes of ConvNormAct are
    # not exercised here; this implements the conv_type='basic', mode=None branch.
    N, Cin, Cout, H, W = 2, 4, 8, 16, 16
    key = jax.random.PRNGKey(0)
    kx, kw, kg, kb = jax.random.split(key, 4)

    x = jax.random.normal(kx, (N, Cin, H, W), dtype=jnp.float32)
    w = 0.1 * jax.random.normal(kw, (Cout, Cin, 3, 3), dtype=jnp.float32)
    # BatchNorm2d affine params (default init would be gamma=1, beta=0; perturb to
    # exercise the scale/shift fold).
    gamma = 1.0 + 0.1 * jax.random.normal(kg, (Cout,), dtype=jnp.float32)
    beta = 0.1 * jax.random.normal(kb, (Cout,), dtype=jnp.float32)

    out = jax.jit(conv_norm_act)(x, w, gamma, beta)
    out = jax.block_until_ready(out)

    ref = _reference(x, w, gamma, beta)
    assert out.shape == (N, Cout, H, W)
    # bf16 MXU operands (f32 accumulation) vs f32 reference -> relaxed tolerance.
    max_err = float(jnp.max(jnp.abs(out - ref)))
    assert jnp.allclose(out, ref, atol=3e-2, rtol=3e-2), max_err

    print("KERNEL_OK")
</pallas_src>

<mosaic_0001>
module attributes {stable_mosaic.version = 11 : i64} {
  func.func @conv_stats_kernel(%arg0: i32, %arg1: memref<1x10x18x4xbf16, #tpu.memory_space<vmem>>, %arg2: memref<9x4x128xbf16, #tpu.memory_space<vmem>>, %arg3: memref<1x128x128xf32, #tpu.memory_space<vmem>>, %arg4: memref<1x2x128xf32, #tpu.memory_space<vmem>>) attributes {dimension_semantics = [#tpu.dimension_semantics<parallel>], iteration_bounds = array<i64: 4>, scalar_prefetch = 0 : i64, scratch_operands = 0 : i64, tpu.core_type = #tpu.core_type<tc>, window_params = [{transform_indices = @transform_0, window_bounds = array<i64: 1, 10, 18, 4>}, {pipeline_mode = #tpu.pipeline_mode<synchronous>, transform_indices = @transform_1, window_bounds = array<i64: 9, 4, 128>}, {transform_indices = @transform_2, window_bounds = array<i64: 1, 128, 128>}, {transform_indices = @transform_3, window_bounds = array<i64: 1, 2, 128>}]} {
    %cst = arith.constant 0.000000e+00 : f32
    %0 = vector.broadcast %cst : f32 to vector<128x128xf32>
    %c0 = arith.constant 0 : index
    %c0_0 = arith.constant 0 : index
    %c0_1 = arith.constant 0 : index
    %c0_2 = arith.constant 0 : index
    %1 = vector.load %arg1[%c0, %c0_0, %c0_1, %c0_2] : memref<1x10x18x4xbf16, #tpu.memory_space<vmem>>, vector<1x8x16x4xbf16>
    %2 = vector.shape_cast %1 : vector<1x8x16x4xbf16> to vector<8x16x4xbf16>
    %3 = vector.shape_cast %2 : vector<8x16x4xbf16> to vector<128x4xbf16>
    %c0_3 = arith.constant 0 : index
    %c0_4 = arith.constant 0 : index
    %c0_5 = arith.constant 0 : index
    %4 = vector.load %arg2[%c0_3, %c0_4, %c0_5] : memref<9x4x128xbf16, #tpu.memory_space<vmem>>, vector<1x4x128xbf16>
    %5 = vector.shape_cast %4 : vector<1x4x128xbf16> to vector<4x128xbf16>
    %cst_6 = arith.constant dense<0.000000e+00> : vector<128x128xf32>
    %6 = tpu.matmul %3, %5, %cst_6 {dimension_numbers = #tpu.dot_dimension_numbers<[1], [0], [0], [1], [0, 0, 1, 1], [], []>} : vector<128x4xbf16>, vector<4x128xbf16>, vector<128x128xf32> -> vector<128x128xf32>
    %7 = arith.addf %0, %6 : vector<128x128xf32>
    %c0_7 = arith.constant 0 : index
    %c0_8 = arith.constant 0 : index
    %c1 = arith.constant 1 : index
    %c0_9 = arith.constant 0 : index
    %8 = vector.load %arg1[%c0_7, %c0_8, %c1, %c0_9] : memref<1x10x18x4xbf16, #tpu.memory_space<vmem>>, vector<1x8x16x4xbf16>
    %9 = vector.shape_cast %8 : vector<1x8x16x4xbf16> to vector<8x16x4xbf16>
    %10 = vector.shape_cast %9 : vector<8x16x4xbf16> to vector<128x4xbf16>
    %c1_10 = arith.constant 1 : index
    %c0_11 = arith.constant 0 : index
    %c0_12 = arith.constant 0 : index
    %11 = vector.load %arg2[%c1_10, %c0_11, %c0_12] : memref<9x4x128xbf16, #tpu.memory_space<vmem>>, vector<1x4x128xbf16>
    %12 = vector.shape_cast %11 : vector<1x4x128xbf16> to vector<4x128xbf16>
    %cst_13 = arith.constant dense<0.000000e+00> : vector<128x128xf32>
    %13 = tpu.matmul %10, %12, %cst_13 {dimension_numbers = #tpu.dot_dimension_numbers<[1], [0], [0], [1], [0, 0, 1, 1], [], []>} : vector<128x4xbf16>, vector<4x128xbf16>, vector<128x128xf32> -> vector<128x128xf32>
    %14 = arith.addf %7, %13 : vector<128x128xf32>
    %c0_14 = arith.constant 0 : index
    %c0_15 = arith.constant 0 : index
    %c2 = arith.constant 2 : index
    %c0_16 = arith.constant 0 : index
    %15 = vector.load %arg1[%c0_14, %c0_15, %c2, %c0_16] : memref<1x10x18x4xbf16, #tpu.memory_space<vmem>>, vector<1x8x16x4xbf16>
    %16 = vector.shape_cast %15 : vector<1x8x16x4xbf16> to vector<8x16x4xbf16>
    %17 = vector.shape_cast %16 : vector<8x16x4xbf16> to vector<128x4xbf16>
    %c2_17 = arith.constant 2 : index
    %c0_18 = arith.constant 0 : index
    %c0_19 = arith.constant 0 : index
    %18 = vector.load %arg2[%c2_17, %c0_18, %c0_19] : memref<9x4x128xbf16, #tpu.memory_space<vmem>>, vector<1x4x128xbf16>
    %19 = vector.shape_cast %18 : vector<1x4x128xbf16> to vector<4x128xbf16>
    %cst_20 = arith.constant dense<0.000000e+00> : vector<128x128xf32>
    %20 = tpu.matmul %17, %19, %cst_20 {dimension_numbers = #tpu.dot_dimension_numbers<[1], [0], [0], [1], [0, 0, 1, 1], [], []>} : vector<128x4xbf16>, vector<4x128xbf16>, vector<128x128xf32> -> vector<128x128xf32>
    %21 = arith.addf %14, %20 : vector<128x128xf32>
    %c0_21 = arith.constant 0 : index
    %c1_22 = arith.constant 1 : index
    %c0_23 = arith.constant 0 : index
    %c0_24 = arith.constant 0 : index
    %22 = vector.load %arg1[%c0_21, %c1_22, %c0_23, %c0_24] : memref<1x10x18x4xbf16, #tpu.memory_space<vmem>>, vector<1x8x16x4xbf16>
    %23 = vector.shape_cast %22 : vector<1x8x16x4xbf16> to vector<8x16x4xbf16>
    %24 = vector.shape_cast %23 : vector<8x16x4xbf16> to vector<128x4xbf16>
    %c3 = arith.constant 3 : index
    %c0_25 = arith.constant 0 : index
    %c0_26 = arith.constant 0 : index
    %25 = vector.load %arg2[%c3, %c0_25, %c0_26] : memref<9x4x128xbf16, #tpu.memory_space<vmem>>, vector<1x4x128xbf16>
    %26 = vector.shape_cast %25 : vector<1x4x128xbf16> to vector<4x128xbf16>
    %cst_27 = arith.constant dense<0.000000e+00> : vector<128x128xf32>
    %27 = tpu.matmul %24, %26, %cst_27 {dimension_numbers = #tpu.dot_dimension_numbers<[1], [0], [0], [1], [0, 0, 1, 1], [], []>} : vector<128x4xbf16>, vector<4x128xbf16>, vector<128x128xf32> -> vector<128x128xf32>
    %28 = arith.addf %21, %27 : vector<128x128xf32>
    %c0_28 = arith.constant 0 : index
    %c1_29 = arith.constant 1 : index
    %c1_30 = arith.constant 1 : index
    %c0_31 = arith.constant 0 : index
    %29 = vector.load %arg1[%c0_28, %c1_29, %c1_30, %c0_31] : memref<1x10x18x4xbf16, #tpu.memory_space<vmem>>, vector<1x8x16x4xbf16>
    %30 = vector.shape_cast %29 : vector<1x8x16x4xbf16> to vector<8x16x4xbf16>
    %31 = vector.shape_cast %30 : vector<8x16x4xbf16> to vector<128x4xbf16>
    %c4 = arith.constant 4 : index
    %c0_32 = arith.constant 0 : index
    %c0_33 = arith.constant 0 : index
    %32 = vector.load %arg2[%c4, %c0_32, %c0_33] : memref<9x4x128xbf16, #tpu.memory_space<vmem>>, vector<1x4x128xbf16>
    %33 = vector.shape_cast %32 : vector<1x4x128xbf16> to vector<4x128xbf16>
    %cst_34 = arith.constant dense<0.000000e+00> : vector<128x128xf32>
    %34 = tpu.matmul %31, %33, %cst_34 {dimension_numbers = #tpu.dot_dimension_numbers<[1], [0], [0], [1], [0, 0, 1, 1], [], []>} : vector<128x4xbf16>, vector<4x128xbf16>, vector<128x128xf32> -> vector<128x128xf32>
    %35 = arith.addf %28, %34 : vector<128x128xf32>
    %c0_35 = arith.constant 0 : index
    %c1_36 = arith.constant 1 : index
    %c2_37 = arith.constant 2 : index
    %c0_38 = arith.constant 0 : index
    %36 = vector.load %arg1[%c0_35, %c1_36, %c2_37, %c0_38] : memref<1x10x18x4xbf16, #tpu.memory_space<vmem>>, vector<1x8x16x4xbf16>
    %37 = vector.shape_cast %36 : vector<1x8x16x4xbf16> to vector<8x16x4xbf16>
    %38 = vector.shape_cast %37 : vector<8x16x4xbf16> to vector<128x4xbf16>
    %c5 = arith.constant 5 : index
    %c0_39 = arith.constant 0 : index
    %c0_40 = arith.constant 0 : index
    %39 = vector.load %arg2[%c5, %c0_39, %c0_40] : memref<9x4x128xbf16, #tpu.memory_space<vmem>>, vector<1x4x128xbf16>
    %40 = vector.shape_cast %39 : vector<1x4x128xbf16> to vector<4x128xbf16>
    %cst_41 = arith.constant dense<0.000000e+00> : vector<128x128xf32>
    %41 = tpu.matmul %38, %40, %cst_41 {dimension_numbers = #tpu.dot_dimension_numbers<[1], [0], [0], [1], [0, 0, 1, 1], [], []>} : vector<128x4xbf16>, vector<4x128xbf16>, vector<128x128xf32> -> vector<128x128xf32>
    %42 = arith.addf %35, %41 : vector<128x128xf32>
    %c0_42 = arith.constant 0 : index
    %c2_43 = arith.constant 2 : index
    %c0_44 = arith.constant 0 : index
    %c0_45 = arith.constant 0 : index
    %43 = vector.load %arg1[%c0_42, %c2_43, %c0_44, %c0_45] : memref<1x10x18x4xbf16, #tpu.memory_space<vmem>>, vector<1x8x16x4xbf16>
    %44 = vector.shape_cast %43 : vector<1x8x16x4xbf16> to vector<8x16x4xbf16>
    %45 = vector.shape_cast %44 : vector<8x16x4xbf16> to vector<128x4xbf16>
    %c6 = arith.constant 6 : index
    %c0_46 = arith.constant 0 : index
    %c0_47 = arith.constant 0 : index
    %46 = vector.load %arg2[%c6, %c0_46, %c0_47] : memref<9x4x128xbf16, #tpu.memory_space<vmem>>, vector<1x4x128xbf16>
    %47 = vector.shape_cast %46 : vector<1x4x128xbf16> to vector<4x128xbf16>
    %cst_48 = arith.constant dense<0.000000e+00> : vector<128x128xf32>
    %48 = tpu.matmul %45, %47, %cst_48 {dimension_numbers = #tpu.dot_dimension_numbers<[1], [0], [0], [1], [0, 0, 1, 1], [], []>} : vector<128x4xbf16>, vector<4x128xbf16>, vector<128x128xf32> -> vector<128x128xf32>
    %49 = arith.addf %42, %48 : vector<128x128xf32>
    %c0_49 = arith.constant 0 : index
    %c2_50 = arith.constant 2 : index
    %c1_51 = arith.constant 1 : index
    %c0_52 = arith.constant 0 : index
    %50 = vector.load %arg1[%c0_49, %c2_50, %c1_51, %c0_52] : memref<1x10x18x4xbf16, #tpu.memory_space<vmem>>, vector<1x8x16x4xbf16>
    %51 = vector.shape_cast %50 : vector<1x8x16x4xbf16> to vector<8x16x4xbf16>
    %52 = vector.shape_cast %51 : vector<8x16x4xbf16> to vector<128x4xbf16>
    %c7 = arith.constant 7 : index
    %c0_53 = arith.constant 0 : index
    %c0_54 = arith.constant 0 : index
    %53 = vector.load %arg2[%c7, %c0_53, %c0_54] : memref<9x4x128xbf16, #tpu.memory_space<vmem>>, vector<1x4x128xbf16>
    %54 = vector.shape_cast %53 : vector<1x4x128xbf16> to vector<4x128xbf16>
    %cst_55 = arith.constant dense<0.000000e+00> : vector<128x128xf32>
    %55 = tpu.matmul %52, %54, %cst_55 {dimension_numbers = #tpu.dot_dimension_numbers<[1], [0], [0], [1], [0, 0, 1, 1], [], []>} : vector<128x4xbf16>, vector<4x128xbf16>, vector<128x128xf32> -> vector<128x128xf32>
    %56 = arith.addf %49, %55 : vector<128x128xf32>
    %c0_56 = arith.constant 0 : index
    %c2_57 = arith.constant 2 : index
    %c2_58 = arith.constant 2 : index
    %c0_59 = arith.constant 0 : index
    %57 = vector.load %arg1[%c0_56, %c2_57, %c2_58, %c0_59] : memref<1x10x18x4xbf16, #tpu.memory_space<vmem>>, vector<1x8x16x4xbf16>
    %58 = vector.shape_cast %57 : vector<1x8x16x4xbf16> to vector<8x16x4xbf16>
    %59 = vector.shape_cast %58 : vector<8x16x4xbf16> to vector<128x4xbf16>
    %c8 = arith.constant 8 : index
    %c0_60 = arith.constant 0 : index
    %c0_61 = arith.constant 0 : index
    %60 = vector.load %arg2[%c8, %c0_60, %c0_61] : memref<9x4x128xbf16, #tpu.memory_space<vmem>>, vector<1x4x128xbf16>
    %61 = vector.shape_cast %60 : vector<1x4x128xbf16> to vector<4x128xbf16>
    %cst_62 = arith.constant dense<0.000000e+00> : vector<128x128xf32>
    %62 = tpu.matmul %59, %61, %cst_62 {dimension_numbers = #tpu.dot_dimension_numbers<[1], [0], [0], [1], [0, 0, 1, 1], [], []>} : vector<128x4xbf16>, vector<4x128xbf16>, vector<128x128xf32> -> vector<128x128xf32>
    %63 = arith.addf %56, %62 : vector<128x128xf32>
    %c0_63 = arith.constant 0 : index
    %c0_64 = arith.constant 0 : index
    %c0_65 = arith.constant 0 : index
    %64 = vector.load %arg3[%c0_63, %c0_64, %c0_65] : memref<1x128x128xf32, #tpu.memory_space<vmem>>, vector<1x128x128xf32>
    %65 = vector.shape_cast %64 : vector<1x128x128xf32> to vector<128x128xf32>
    %66 = vector.shape_cast %63 : vector<128x128xf32> to vector<1x128x128xf32>
    tpu.vector_store %arg3[%c0_63, %c0_64, %c0_65], %66 {strides = array<i32>} : memref<1x128x128xf32, #tpu.memory_space<vmem>>, vector<1x128x128xf32>,
    %cst_66 = arith.constant dense<0.000000e+00> : vector<128xf32>
    %67 = vector.multi_reduction <add>, %63, %cst_66 [0] : vector<128x128xf32> to vector<128xf32>
    %68 = vector.shape_cast %67 : vector<128xf32> to vector<1x128xf32>
    %69 = arith.mulf %63, %63 : vector<128x128xf32>
    %cst_67 = arith.constant dense<0.000000e+00> : vector<128xf32>
    %70 = vector.multi_reduction <add>, %69, %cst_67 [0] : vector<128x128xf32> to vector<128xf32>
    %71 = vector.shape_cast %70 : vector<128xf32> to vector<1x128xf32>
    %72 = tpu.concatenate %68, %71 in 0 : vector<1x128xf32>, vector<1x128xf32> -> vector<2x128xf32>
    %c0_68 = arith.constant 0 : index
    %c0_69 = arith.constant 0 : index
    %c0_70 = arith.constant 0 : index
    %73 = vector.load %arg4[%c0_68, %c0_69, %c0_70] : memref<1x2x128xf32, #tpu.memory_space<vmem>>, vector<1x2x128xf32>
    %74 = vector.shape_cast %73 : vector<1x2x128xf32> to vector<2x128xf32>
    %75 = vector.shape_cast %72 : vector<2x128xf32> to vector<1x2x128xf32>
    tpu.vector_store %arg4[%c0_68, %c0_69, %c0_70], %75 {strides = array<i32>} : memref<1x2x128xf32, #tpu.memory_space<vmem>>, vector<1x2x128xf32>,
    return
  }
  func.func @transform_0(%arg0: i32) -> (i32, i32, i32, i32) {
    %c0_i32 = arith.constant 0 : i32
    %c0_i32_0 = arith.constant 0 : i32
    %c0_i32_1 = arith.constant 0 : i32
    %c0_i32_2 = arith.constant 0 : i32
    return %arg0, %c0_i32, %c0_i32_0, %c0_i32_1 : i32, i32, i32, i32
  }
  func.func @transform_1(%arg0: i32) -> (i32, i32, i32) {
    %c0_i32 = arith.constant 0 : i32
    %c0_i32_0 = arith.constant 0 : i32
    %c0_i32_1 = arith.constant 0 : i32
    %c0_i32_2 = arith.constant 0 : i32
    return %c0_i32, %c0_i32_0, %c0_i32_1 : i32, i32, i32
  }
  func.func @transform_2(%arg0: i32) -> (i32, i32, i32) {
    %c0_i32 = arith.constant 0 : i32
    %c0_i32_0 = arith.constant 0 : i32
    %c0_i32_1 = arith.constant 0 : i32
    return %arg0, %c0_i32, %c0_i32_0 : i32, i32, i32
  }
  func.func @transform_3(%arg0: i32) -> (i32, i32, i32) {
    %c0_i32 = arith.constant 0 : i32
    %c0_i32_0 = arith.constant 0 : i32
    %c0_i32_1 = arith.constant 0 : i32
    return %arg0, %c0_i32, %c0_i32_0 : i32, i32, i32
  }
}

module attributes {stable_mosaic.version = 11 : i64} {
  func.func @bn_relu_kernel(%arg0: i32, %arg1: memref<512x128xf32, #tpu.memory_space<vmem>>, %arg2: memref<1x128xf32, #tpu.memory_space<vmem>>, %arg3: memref<1x128xf32, #tpu.memory_space<vmem>>, %arg4: memref<512x128xf32, #tpu.memory_space<vmem>>) attributes {dimension_semantics = [#tpu.dimension_semantics<parallel>], iteration_bounds = array<i64: 1>, scalar_prefetch = 0 : i64, scratch_operands = 0 : i64, tpu.core_type = #tpu.core_type<tc>, window_params = [{transform_indices = @transform_0, window_bounds = array<i64: 512, 128>}, {pipeline_mode = #tpu.pipeline_mode<synchronous>, transform_indices = @transform_1, window_bounds = array<i64: 1, 128>}, {pipeline_mode = #tpu.pipeline_mode<synchronous>, transform_indices = @transform_2, window_bounds = array<i64: 1, 128>}, {transform_indices = @transform_3, window_bounds = array<i64: 512, 128>}]} {
    %c0 = arith.constant 0 : index
    %c0_0 = arith.constant 0 : index
    %0 = vector.load %arg1[%c0, %c0_0] : memref<512x128xf32, #tpu.memory_space<vmem>>, vector<512x128xf32>
    %c0_1 = arith.constant 0 : index
    %c0_2 = arith.constant 0 : index
    %1 = vector.load %arg2[%c0_1, %c0_2] : memref<1x128xf32, #tpu.memory_space<vmem>>, vector<1x128xf32>
    %2 = vector.broadcast %1 : vector<1x128xf32> to vector<512x128xf32>
    %3 = arith.mulf %0, %2 : vector<512x128xf32>
    %c0_3 = arith.constant 0 : index
    %c0_4 = arith.constant 0 : index
    %4 = vector.load %arg3[%c0_3, %c0_4] : memref<1x128xf32, #tpu.memory_space<vmem>>, vector<1x128xf32>
    %5 = vector.broadcast %4 : vector<1x128xf32> to vector<512x128xf32>
    %6 = arith.addf %3, %5 : vector<512x128xf32>
    %cst = arith.constant 0.000000e+00 : f32
    %7 = vector.broadcast %cst : f32 to vector<512x128xf32>
    %8 = arith.maximumf %6, %7 : vector<512x128xf32>
    %c0_5 = arith.constant 0 : index
    %c0_6 = arith.constant 0 : index
    %9 = vector.load %arg4[%c0_5, %c0_6] : memref<512x128xf32, #tpu.memory_space<vmem>>, vector<512x128xf32>
    tpu.vector_store %arg4[%c0_5, %c0_6], %8 {strides = array<i32>} : memref<512x128xf32, #tpu.memory_space<vmem>>, vector<512x128xf32>,
    return
  }
  func.func @transform_0(%arg0: i32) -> (i32, i32) {
    %c0_i32 = arith.constant 0 : i32
    %c0_i32_0 = arith.constant 0 : i32
    return %arg0, %c0_i32 : i32, i32
  }
  func.func @transform_1(%arg0: i32) -> (i32, i32) {
    %c0_i32 = arith.constant 0 : i32
    %c0_i32_0 = arith.constant 0 : i32
    %c0_i32_1 = arith.constant 0 : i32
    return %c0_i32, %c0_i32_0 : i32, i32
  }
  func.func @transform_2(%arg0: i32) -> (i32, i32) {
    %c0_i32 = arith.constant 0 : i32
    %c0_i32_0 = arith.constant 0 : i32
    %c0_i32_1 = arith.constant 0 : i32
    return %c0_i32, %c0_i32_0 : i32, i32
  }
  func.func @transform_3(%arg0: i32) -> (i32, i32) {
    %c0_i32 = arith.constant 0 : i32
    %c0_i32_0 = arith.constant 0 : i32
    return %arg0, %c0_i32 : i32, i32
  }
}

</mosaic_0001>

<bundles_post_ra>
// kernel: conv_norm_act.3
= control target key start
LH: loop header
LB: loop body
LE: loop exit
PB: predicated region body
PF: predicated region fallthrough
CT: control target
= control target key end

     0   :  { %s896_s0 = inlined_call_operand.vmem [shape: f32[512,128], index: 0, kind: input, shape index: {}, may-alias: {0,3}]   ;;  %s897_s1 = inlined_call_operand.vmem [shape: f32[1,128], index: 1, kind: input, shape index: {}]   ;;  %s898_s2 = inlined_call_operand.vmem [shape: f32[1,128], index: 2, kind: input, shape index: {}]   ;;  %s899_s3 = inlined_call_operand.vmem [shape: f32[512,128], index: 3, kind: output, shape index: {}, may-alias: {0,3}]  }
   0x1   :  { %v14_v0 = vld [vmem:[%s896_s0] sm:$0xff]  ;;  %v15_v4 = vld [vmem:[%s896_s0 + $0x8] sm:$0xff]  ;;  %v16_v5 = vld [vmem:[%s896_s0 + $0x10] sm:$0xff] }
   0x2   :  { %v380_v1 = vld [vmem:[%s897_s1] ss:$0 sm:$0xff]  ;;  %v17_v6 = vld [vmem:[%s896_s0 + $0x18] sm:$0xff]  ;;  %v19_v11 = vld [vmem:[%s896_s0 + $0x28] sm:$0xff] }
   0x3   :  { %v385_v2 = vld [vmem:[%s898_s2] ss:$0 sm:$0xff]  ;;  %v85_v3 = vmul.f32 %v380_v1, %v14_v0  ;;  %v86_v7 = vmul.f32 %v380_v1, %v15_v4  ;;  %v87_v8 = vmul.f32 %v380_v1, %v16_v5  ;;  %v88_v9 = vmul.f32 %v380_v1, %v17_v6  ;;  %v20_v12 = vld [vmem:[%s896_s0 + $0x30] sm:$0xff]  ;;  %v21_v17 = vld [vmem:[%s896_s0 + $0x38] sm:$0xff] }
   0x4   :  { %v18_v10 = vld [vmem:[%s896_s0 + $0x20] sm:$0xff]  ;;  %v90_v15 = vmul.f32 %v380_v1, %v19_v11  ;;  %v91_v16 = vmul.f32 %v380_v1, %v20_v12  ;;  %v92_v21 = vmul.f32 %v380_v1, %v21_v17  ;;  %v23_v27 = vld [vmem:[%s896_s0 + $0x48] sm:$0xff]  ;;  %v24_v28 = vld [vmem:[%s896_s0 + $0x50] sm:$0xff] }
   0x5   :  { %v156_v13 = vadd.f32 %v385_v2, %v85_v3  ;;  %v89_v14 = vmul.f32 %v380_v1, %v18_v10  ;;  %v157_v18 = vadd.f32 %v385_v2, %v86_v7  ;;  %v158_v19 = vadd.f32 %v385_v2, %v87_v8  ;;  %v22_v22 = vld [vmem:[%s896_s0 + $0x40] sm:$0xff]  ;;  %v25_v29 = vld [vmem:[%s896_s0 + $0x58] sm:$0xff]  ;;  %v27_v35 = vld [vmem:[%s896_s0 + $0x68] sm:$0xff] }
   0x6   :  { %v159_v20 = vadd.f32 %v385_v2, %v88_v9  ;;  %v161_v25 = vadd.f32 %v385_v2, %v90_v15  ;;  %v162_v26 = vadd.f32 %v385_v2, %v91_v16  ;;  %v163_v33 = vadd.f32 %v385_v2, %v92_v21  ;;  %v26_v34 = vld [vmem:[%s896_s0 + $0x60] sm:$0xff]  ;;  %v28_v36 = vld [vmem:[%s896_s0 + $0x70] sm:$0xff] }
   0x7   :  { %v220_v23 = vmax.f32 %v156_v13, 0.0  ;;  %v160_v24 = vadd.f32 %v385_v2, %v89_v14  ;;  %v221_v30 = vmax.f32 %v157_v18, 0.0  ;;  %v222_v31 = vmax.f32 %v158_v19, 0.0 }
   0x8   :  { %v223_v32 = vmax.f32 %v159_v20, 0.0  ;;  %v225_v38 = vmax.f32 %v161_v25, 0.0  ;;  %v226_v39 = vmax.f32 %v162_v26, 0.0  ;;  %v93_v40 = vmul.f32 %v380_v1, %v22_v22 }
   0x9   :  { %284 = vst [vmem:[%s899_s3] sm:$0xff] %v220_v23  ;;  %v224_v37 = vmax.f32 %v160_v24, 0.0  ;;  %v227_v42 = vmax.f32 %v163_v33, 0.0  ;;  %v94_v43 = vmul.f32 %v380_v1, %v23_v27  ;;  %v95_v44 = vmul.f32 %v380_v1, %v24_v28 }
   0xa   :  { %v96_v45 = vmul.f32 %v380_v1, %v25_v29  ;;  %v164_v46 = vadd.f32 %v385_v2, %v93_v40  ;;  %v97_v47 = vmul.f32 %v380_v1, %v26_v34  ;;  %v98_v48 = vmul.f32 %v380_v1, %v27_v35 }
   0xb   :  { %v99_v49 = vmul.f32 %v380_v1, %v28_v36  ;;  %v165_v50 = vadd.f32 %v385_v2, %v94_v43  ;;  %v166_v51 = vadd.f32 %v385_v2, %v95_v44 }
   0xc   :  { %v167_v52 = vadd.f32 %v385_v2, %v96_v45  ;;  %v228_v55 = vmax.f32 %v164_v46, 0.0  ;;  %v168_v56 = vadd.f32 %v385_v2, %v97_v47  ;;  %v169_v57 = vadd.f32 %v385_v2, %v98_v48 }
   0xd   :  { %v170_v58 = vadd.f32 %v385_v2, %v99_v49  ;;  %v229_v62 = vmax.f32 %v165_v50, 0.0  ;;  %v230_v63 = vmax.f32 %v166_v51, 0.0 }
   0xe   :  { %v231_v0 = vmax.f32 %v167_v52, 0.0  ;;  %v232_v7 = vmax.f32 %v168_v56, 0.0  ;;  %v233_v8 = vmax.f32 %v169_v57, 0.0 }
   0xf   :  { %v234_v9 = vmax.f32 %v170_v58, 0.0 }
  0x10   :  { %v29_v41 = vld [vmem:[%s896_s0 + $0x78] sm:$0xff] }
  0x11   :  { %285 = vst [vmem:[%s899_s3 + $0x8] sm:$0xff] %v221_v30  ;;  %286 = vst [vmem:[%s899_s3 + $0x10] sm:$0xff] %v222_v31  ;;  %v100_v53 = vmul.f32 %v380_v1, %v29_v41 }
  0x12   :  { %287 = vst [vmem:[%s899_s3 + $0x18] sm:$0xff] %v223_v32  ;;  %288 = vst [vmem:[%s899_s3 + $0x20] sm:$0xff] %v224_v37 }
  0x13   :  { %289 = vst [vmem:[%s899_s3 + $0x28] sm:$0xff] %v225_v38  ;;  %290 = vst [vmem:[%s899_s3 + $0x30] sm:$0xff] %v226_v39  ;;  %v171_v3 = vadd.f32 %v385_v2, %v100_v53 }
  0x14   :  { %291 = vst [vmem:[%s899_s3 + $0x38] sm:$0xff] %v227_v42 }
  0x15   :  { %v235_v12 = vmax.f32 %v171_v3, 0.0 }
  0x1b   :  { %v30_v54 = vld [vmem:[%s896_s0 + $0x80] sm:$0xff]  ;;  %v31_v59 = vld [vmem:[%s896_s0 + $0x88] sm:$0xff]  ;;  %v32_v60 = vld [vmem:[%s896_s0 + $0x90] sm:$0xff] }
  0x1c   :  { %v33_v61 = vld [vmem:[%s896_s0 + $0x98] sm:$0xff]  ;;  %v34_v4 = vld [vmem:[%s896_s0 + $0xa0] sm:$0xff]  ;;  %v35_v5 = vld [vmem:[%s896_s0 + $0xa8] sm:$0xff]  ;;  %v101_v10 = vmul.f32 %v380_v1, %v30_v54  ;;  %v102_v13 = vmul.f32 %v380_v1, %v31_v59  ;;  %v103_v14 = vmul.f32 %v380_v1, %v32_v60 }
  0x1d   :  { %v36_v6 = vld [vmem:[%s896_s0 + $0xb0] sm:$0xff]  ;;  %v104_v15 = vmul.f32 %v380_v1, %v33_v61  ;;  %v105_v17 = vmul.f32 %v380_v1, %v34_v4  ;;  %v106_v18 = vmul.f32 %v380_v1, %v35_v5 }
  0x1e   :  { %292 = vst [vmem:[%s899_s3 + $0x40] sm:$0xff] %v228_v55  ;;  %v172_v16 = vadd.f32 %v385_v2, %v101_v10  ;;  %v107_v19 = vmul.f32 %v380_v1, %v36_v6  ;;  %v173_v20 = vadd.f32 %v385_v2, %v102_v13  ;;  %v174_v21 = vadd.f32 %v385_v2, %v103_v14 }
  0x1f   :  { %v175_v22 = vadd.f32 %v385_v2, %v104_v15  ;;  %v176_v26 = vadd.f32 %v385_v2, %v105_v17  ;;  %v177_v27 = vadd.f32 %v385_v2, %v106_v18 }
  0x20   :  { %v236_v25 = vmax.f32 %v172_v16, 0.0  ;;  %v178_v28 = vadd.f32 %v385_v2, %v107_v19  ;;  %v237_v32 = vmax.f32 %v173_v20, 0.0  ;;  %v238_v33 = vmax.f32 %v174_v21, 0.0 }
  0x21   :  { %v239_v34 = vmax.f32 %v175_v22, 0.0  ;;  %v240_v39 = vmax.f32 %v176_v26, 0.0  ;;  %v241_v40 = vmax.f32 %v177_v27, 0.0 }
  0x22   :  { %v242_v41 = vmax.f32 %v178_v28, 0.0 }
  0x25   :  { %v37_v11 = vld [vmem:[%s896_s0 + $0xb8] sm:$0xff] }
  0x26   :  { %293 = vst [vmem:[%s899_s3 + $0x48] sm:$0xff] %v229_v62  ;;  %294 = vst [vmem:[%s899_s3 + $0x50] sm:$0xff] %v230_v63  ;;  %v108_v23 = vmul.f32 %v380_v1, %v37_v11 }
  0x27   :  { %295 = vst [vmem:[%s899_s3 + $0x58] sm:$0xff] %v231_v0  ;;  %296 = vst [vmem:[%s899_s3 + $0x60] sm:$0xff] %v232_v7 }
  0x28   :  { %297 = vst [vmem:[%s899_s3 + $0x68] sm:$0xff] %v233_v8  ;;  %298 = vst [vmem:[%s899_s3 + $0x70] sm:$0xff] %v234_v9  ;;  %v179_v35 = vadd.f32 %v385_v2, %v108_v23 }
  0x29   :  { %299 = vst [vmem:[%s899_s3 + $0x78] sm:$0xff] %v235_v12 }
  0x2a   :  { %v243_v44 = vmax.f32 %v179_v35, 0.0 }
  0x30   :  { %v38_v24 = vld [vmem:[%s896_s0 + $0xc0] sm:$0xff]  ;;  %v39_v29 = vld [vmem:[%s896_s0 + $0xc8] sm:$0xff]  ;;  %v40_v30 = vld [vmem:[%s896_s0 + $0xd0] sm:$0xff] }
  0x31   :  { %v41_v31 = vld [vmem:[%s896_s0 + $0xd8] sm:$0xff]  ;;  %v42_v36 = vld [vmem:[%s896_s0 + $0xe0] sm:$0xff]  ;;  %v43_v37 = vld [vmem:[%s896_s0 + $0xe8] sm:$0xff]  ;;  %v109_v42 = vmul.f32 %v380_v1, %v38_v24  ;;  %v110_v45 = vmul.f32 %v380_v1, %v39_v29  ;;  %v111_v46 = vmul.f32 %v380_v1, %v40_v30 }
  0x32   :  { %v44_v38 = vld [vmem:[%s896_s0 + $0xf0] sm:$0xff]  ;;  %v112_v47 = vmul.f32 %v380_v1, %v41_v31  ;;  %v113_v49 = vmul.f32 %v380_v1, %v42_v36  ;;  %v114_v50 = vmul.f32 %v380_v1, %v43_v37 }
  0x33   :  { %300 = vst [vmem:[%s899_s3 + $0x80] sm:$0xff] %v236_v25  ;;  %v180_v48 = vadd.f32 %v385_v2, %v109_v42  ;;  %v115_v51 = vmul.f32 %v380_v1, %v44_v38  ;;  %v181_v52 = vadd.f32 %v385_v2, %v110_v45  ;;  %v182_v53 = vadd.f32 %v385_v2, %v111_v46 }
  0x34   :  { %v183_v54 = vadd.f32 %v385_v2, %v112_v47  ;;  %v184_v58 = vadd.f32 %v385_v2, %v113_v49  ;;  %v185_v59 = vadd.f32 %v385_v2, %v114_v50 }
  0x35   :  { %v244_v57 = vmax.f32 %v180_v48, 0.0  ;;  %v186_v60 = vadd.f32 %v385_v2, %v115_v51  ;;  %v245_v0 = vmax.f32 %v181_v52, 0.0  ;;  %v246_v3 = vmax.f32 %v182_v53, 0.0 }
  0x36   :  { %v247_v4 = vmax.f32 %v183_v54, 0.0  ;;  %v248_v9 = vmax.f32 %v184_v58, 0.0  ;;  %v249_v10 = vmax.f32 %v185_v59, 0.0 }
  0x37   :  { %v250_v11 = vmax.f32 %v186_v60, 0.0 }
  0x3a   :  { %v45_v43 = vld [vmem:[%s896_s0 + $0xf8] sm:$0xff] }
  0x3b   :  { %301 = vst [vmem:[%s899_s3 + $0x88] sm:$0xff] %v237_v32  ;;  %302 = vst [vmem:[%s899_s3 + $0x90] sm:$0xff] %v238_v33  ;;  %v116_v55 = vmul.f32 %v380_v1, %v45_v43 }
  0x3c   :  { %303 = vst [vmem:[%s899_s3 + $0x98] sm:$0xff] %v239_v34  ;;  %304 = vst [vmem:[%s899_s3 + $0xa0] sm:$0xff] %v240_v39 }
  0x3d   :  { %305 = vst [vmem:[%s899_s3 + $0xa8] sm:$0xff] %v241_v40  ;;  %306 = vst [vmem:[%s899_s3 + $0xb0] sm:$0xff] %v242_v41  ;;  %v187_v5 = vadd.f32 %v385_v2, %v116_v55 }
  0x3e   :  { %307 = vst [vmem:[%s899_s3 + $0xb8] sm:$0xff] %v243_v44 }
  0x3f   :  { %v251_v14 = vmax.f32 %v187_v5, 0.0 }
  0x45   :  { %v46_v56 = vld [vmem:[%s896_s0 + $0x100] sm:$0xff]  ;;  %v47_v61 = vld [vmem:[%s896_s0 + $0x108] sm:$0xff]  ;;  %v48_v62 = vld [vmem:[%s896_s0 + $0x110] sm:$0xff] }
  0x46   :  { %v49_v63 = vld [vmem:[%s896_s0 + $0x118] sm:$0xff]  ;;  %v50_v6 = vld [vmem:[%s896_s0 + $0x120] sm:$0xff]  ;;  %v51_v7 = vld [vmem:[%s896_s0 + $0x128] sm:$0xff]  ;;  %v117_v12 = vmul.f32 %v380_v1, %v46_v56  ;;  %v118_v15 = vmul.f32 %v380_v1, %v47_v61  ;;  %v119_v16 = vmul.f32 %v380_v1, %v48_v62 }
  0x47   :  { %v52_v8 = vld [vmem:[%s896_s0 + $0x130] sm:$0xff]  ;;  %v120_v17 = vmul.f32 %v380_v1, %v49_v63  ;;  %v121_v19 = vmul.f32 %v380_v1, %v50_v6  ;;  %v122_v20 = vmul.f32 %v380_v1, %v51_v7 }
  0x48   :  { %308 = vst [vmem:[%s899_s3 + $0xc0] sm:$0xff] %v244_v57  ;;  %v188_v18 = vadd.f32 %v385_v2, %v117_v12  ;;  %v123_v21 = vmul.f32 %v380_v1, %v52_v8  ;;  %v189_v22 = vadd.f32 %v385_v2, %v118_v15  ;;  %v190_v23 = vadd.f32 %v385_v2, %v119_v16 }
  0x49   :  { %v191_v24 = vadd.f32 %v385_v2, %v120_v17  ;;  %v192_v28 = vadd.f32 %v385_v2, %v121_v19  ;;  %v193_v29 = vadd.f32 %v385_v2, %v122_v20 }
  0x4a   :  { %v252_v27 = vmax.f32 %v188_v18, 0.0  ;;  %v194_v30 = vadd.f32 %v385_v2, %v123_v21  ;;  %v253_v34 = vmax.f32 %v189_v22, 0.0  ;;  %v254_v35 = vmax.f32 %v190_v23, 0.0 }
  0x4b   :  { %v255_v36 = vmax.f32 %v191_v24, 0.0  ;;  %v256_v41 = vmax.f32 %v192_v28, 0.0  ;;  %v257_v42 = vmax.f32 %v193_v29, 0.0 }
  0x4c   :  { %v258_v43 = vmax.f32 %v194_v30, 0.0 }
  0x4f   :  { %v53_v13 = vld [vmem:[%s896_s0 + $0x138] sm:$0xff] }
  0x50   :  { %309 = vst [vmem:[%s899_s3 + $0xc8] sm:$0xff] %v245_v0  ;;  %310 = vst [vmem:[%s899_s3 + $0xd0] sm:$0xff] %v246_v3  ;;  %v124_v25 = vmul.f32 %v380_v1, %v53_v13 }
  0x51   :  { %311 = vst [vmem:[%s899_s3 + $0xd8] sm:$0xff] %v247_v4  ;;  %312 = vst [vmem:[%s899_s3 + $0xe0] sm:$0xff] %v248_v9 }
  0x52   :  { %313 = vst [vmem:[%s899_s3 + $0xe8] sm:$0xff] %v249_v10  ;;  %314 = vst [vmem:[%s899_s3 + $0xf0] sm:$0xff] %v250_v11  ;;  %v195_v37 = vadd.f32 %v385_v2, %v124_v25 }
  0x53   :  { %315 = vst [vmem:[%s899_s3 + $0xf8] sm:$0xff] %v251_v14 }
  0x54   :  { %v259_v46 = vmax.f32 %v195_v37, 0.0 }
  0x5a   :  { %v54_v26 = vld [vmem:[%s896_s0 + $0x140] sm:$0xff]  ;;  %v55_v31 = vld [vmem:[%s896_s0 + $0x148] sm:$0xff]  ;;  %v56_v32 = vld [vmem:[%s896_s0 + $0x150] sm:$0xff] }
  0x5b   :  { %v57_v33 = vld [vmem:[%s896_s0 + $0x158] sm:$0xff]  ;;  %v58_v38 = vld [vmem:[%s896_s0 + $0x160] sm:$0xff]  ;;  %v59_v39 = vld [vmem:[%s896_s0 + $0x168] sm:$0xff]  ;;  %v125_v44 = vmul.f32 %v380_v1, %v54_v26  ;;  %v126_v47 = vmul.f32 %v380_v1, %v55_v31  ;;  %v127_v48 = vmul.f32 %v380_v1, %v56_v32 }
  0x5c   :  { %v60_v40 = vld [vmem:[%s896_s0 + $0x170] sm:$0xff]  ;;  %v128_v49 = vmul.f32 %v380_v1, %v57_v33  ;;  %v129_v51 = vmul.f32 %v380_v1, %v58_v38  ;;  %v130_v52 = vmul.f32 %v380_v1, %v59_v39 }
  0x5d   :  { %316 = vst [vmem:[%s899_s3 + $0x100] sm:$0xff] %v252_v27  ;;  %v196_v50 = vadd.f32 %v385_v2, %v125_v44  ;;  %v131_v53 = vmul.f32 %v380_v1, %v60_v40  ;;  %v197_v54 = vadd.f32 %v385_v2, %v126_v47  ;;  %v198_v55 = vadd.f32 %v385_v2, %v127_v48 }
  0x5e   :  { %v199_v56 = vadd.f32 %v385_v2, %v128_v49  ;;  %v200_v60 = vadd.f32 %v385_v2, %v129_v51  ;;  %v201_v61 = vadd.f32 %v385_v2, %v130_v52 }
  0x5f   :  { %v260_v59 = vmax.f32 %v196_v50, 0.0  ;;  %v202_v62 = vadd.f32 %v385_v2, %v131_v53  ;;  %v261_v4 = vmax.f32 %v197_v54, 0.0  ;;  %v262_v5 = vmax.f32 %v198_v55, 0.0 }
  0x60   :  { %v263_v6 = vmax.f32 %v199_v56, 0.0  ;;  %v264_v11 = vmax.f32 %v200_v60, 0.0  ;;  %v265_v12 = vmax.f32 %v201_v61, 0.0 }
  0x61   :  { %v266_v13 = vmax.f32 %v202_v62, 0.0 }
  0x64   :  { %v61_v45 = vld [vmem:[%s896_s0 + $0x178] sm:$0xff] }
  0x65   :  { %317 = vst [vmem:[%s899_s3 + $0x108] sm:$0xff] %v253_v34  ;;  %318 = vst [vmem:[%s899_s3 + $0x110] sm:$0xff] %v254_v35  ;;  %v132_v57 = vmul.f32 %v380_v1, %v61_v45 }
  0x66   :  { %319 = vst [vmem:[%s899_s3 + $0x118] sm:$0xff] %v255_v36  ;;  %320 = vst [vmem:[%s899_s3 + $0x120] sm:$0xff] %v256_v41 }
  0x67   :  { %321 = vst [vmem:[%s899_s3 + $0x128] sm:$0xff] %v257_v42  ;;  %322 = vst [vmem:[%s899_s3 + $0x130] sm:$0xff] %v258_v43  ;;  %v203_v7 = vadd.f32 %v385_v2, %v132_v57 }
  0x68   :  { %323 = vst [vmem:[%s899_s3 + $0x138] sm:$0xff] %v259_v46 }
  0x69   :  { %v267_v16 = vmax.f32 %v203_v7, 0.0 }
  0x6f   :  { %v62_v58 = vld [vmem:[%s896_s0 + $0x180] sm:$0xff]  ;;  %v63_v63 = vld [vmem:[%s896_s0 + $0x188] sm:$0xff]  ;;  %v64_v0 = vld [vmem:[%s896_s0 + $0x190] sm:$0xff] }
  0x70   :  { %v65_v3 = vld [vmem:[%s896_s0 + $0x198] sm:$0xff]  ;;  %v66_v8 = vld [vmem:[%s896_s0 + $0x1a0] sm:$0xff]  ;;  %v67_v9 = vld [vmem:[%s896_s0 + $0x1a8] sm:$0xff]  ;;  %v133_v14 = vmul.f32 %v380_v1, %v62_v58  ;;  %v134_v17 = vmul.f32 %v380_v1, %v63_v63  ;;  %v135_v18 = vmul.f32 %v380_v1, %v64_v0 }
  0x71   :  { %v68_v10 = vld [vmem:[%s896_s0 + $0x1b0] sm:$0xff]  ;;  %v136_v19 = vmul.f32 %v380_v1, %v65_v3  ;;  %v137_v21 = vmul.f32 %v380_v1, %v66_v8  ;;  %v138_v22 = vmul.f32 %v380_v1, %v67_v9 }
  0x72   :  { %324 = vst [vmem:[%s899_s3 + $0x140] sm:$0xff] %v260_v59  ;;  %v204_v20 = vadd.f32 %v385_v2, %v133_v14  ;;  %v139_v23 = vmul.f32 %v380_v1, %v68_v10  ;;  %v205_v24 = vadd.f32 %v385_v2, %v134_v17  ;;  %v206_v25 = vadd.f32 %v385_v2, %v135_v18 }
  0x73   :  { %v207_v26 = vadd.f32 %v385_v2, %v136_v19  ;;  %v208_v30 = vadd.f32 %v385_v2, %v137_v21  ;;  %v209_v31 = vadd.f32 %v385_v2, %v138_v22 }
  0x74   :  { %v268_v29 = vmax.f32 %v204_v20, 0.0  ;;  %v210_v32 = vadd.f32 %v385_v2, %v139_v23  ;;  %v269_v36 = vmax.f32 %v205_v24, 0.0  ;;  %v270_v37 = vmax.f32 %v206_v25, 0.0 }
  0x75   :  { %v271_v38 = vmax.f32 %v207_v26, 0.0  ;;  %v272_v43 = vmax.f32 %v208_v30, 0.0  ;;  %v273_v44 = vmax.f32 %v209_v31, 0.0 }
  0x76   :  { %v274_v45 = vmax.f32 %v210_v32, 0.0 }
  0x79   :  { %v69_v15 = vld [vmem:[%s896_s0 + $0x1b8] sm:$0xff] }
  0x7a   :  { %325 = vst [vmem:[%s899_s3 + $0x148] sm:$0xff] %v261_v4  ;;  %326 = vst [vmem:[%s899_s3 + $0x150] sm:$0xff] %v262_v5  ;;  %v140_v27 = vmul.f32 %v380_v1, %v69_v15 }
  0x7b   :  { %327 = vst [vmem:[%s899_s3 + $0x158] sm:$0xff] %v263_v6  ;;  %328 = vst [vmem:[%s899_s3 + $0x160] sm:$0xff] %v264_v11 }
  0x7c   :  { %329 = vst [vmem:[%s899_s3 + $0x168] sm:$0xff] %v265_v12  ;;  %330 = vst [vmem:[%s899_s3 + $0x170] sm:$0xff] %v266_v13  ;;  %v211_v39 = vadd.f32 %v385_v2, %v140_v27 }
  0x7d   :  { %331 = vst [vmem:[%s899_s3 + $0x178] sm:$0xff] %v267_v16 }
  0x7e   :  { %v275_v48 = vmax.f32 %v211_v39, 0.0 }
  0x84   :  { %v70_v28 = vld [vmem:[%s896_s0 + $0x1c0] sm:$0xff]  ;;  %v71_v33 = vld [vmem:[%s896_s0 + $0x1c8] sm:$0xff]  ;;  %v72_v34 = vld [vmem:[%s896_s0 + $0x1d0] sm:$0xff] }
  0x85   :  { %v73_v35 = vld [vmem:[%s896_s0 + $0x1d8] sm:$0xff]  ;;  %v74_v40 = vld [vmem:[%s896_s0 + $0x1e0] sm:$0xff]  ;;  %v75_v41 = vld [vmem:[%s896_s0 + $0x1e8] sm:$0xff]  ;;  %v141_v46 = vmul.f32 %v380_v1, %v70_v28  ;;  %v142_v49 = vmul.f32 %v380_v1, %v71_v33  ;;  %v143_v50 = vmul.f32 %v380_v1, %v72_v34 }
  0x86   :  { %v76_v42 = vld [vmem:[%s896_s0 + $0x1f0] sm:$0xff]  ;;  %v144_v51 = vmul.f32 %v380_v1, %v73_v35  ;;  %v145_v53 = vmul.f32 %v380_v1, %v74_v40  ;;  %v146_v54 = vmul.f32 %v380_v1, %v75_v41 }
  0x87   :  { %332 = vst [vmem:[%s899_s3 + $0x180] sm:$0xff] %v268_v29  ;;  %v212_v52 = vadd.f32 %v385_v2, %v141_v46  ;;  %v147_v55 = vmul.f32 %v380_v1, %v76_v42  ;;  %v213_v56 = vadd.f32 %v385_v2, %v142_v49  ;;  %v214_v57 = vadd.f32 %v385_v2, %v143_v50 }
  0x88   :  { %v215_v58 = vadd.f32 %v385_v2, %v144_v51  ;;  %v216_v61 = vadd.f32 %v385_v2, %v145_v53  ;;  %v217_v62 = vadd.f32 %v385_v2, %v146_v54 }
  0x89   :  { %v276_v60 = vmax.f32 %v212_v52, 0.0  ;;  %v218_v63 = vadd.f32 %v385_v2, %v147_v55  ;;  %v277_v0 = vmax.f32 %v213_v56, 0.0  ;;  %v278_v3 = vmax.f32 %v214_v57, 0.0 }
  0x8a   :  { %v279_v4 = vmax.f32 %v215_v58, 0.0  ;;  %v280_v6 = vmax.f32 %v216_v61, 0.0  ;;  %v281_v7 = vmax.f32 %v217_v62, 0.0 }
  0x8b   :  { %v282_v8 = vmax.f32 %v218_v63, 0.0 }
  0x8e   :  { %v77_v47 = vld [vmem:[%s896_s0 + $0x1f8] sm:$0xff] }
  0x8f   :  { %333 = vst [vmem:[%s899_s3 + $0x188] sm:$0xff] %v269_v36  ;;  %334 = vst [vmem:[%s899_s3 + $0x190] sm:$0xff] %v270_v37  ;;  %v148_v59 = vmul.f32 %v380_v1, %v77_v47 }
  0x90   :  { %335 = vst [vmem:[%s899_s3 + $0x198] sm:$0xff] %v271_v38  ;;  %336 = vst [vmem:[%s899_s3 + $0x1a0] sm:$0xff] %v272_v43 }
  0x91   :  { %337 = vst [vmem:[%s899_s3 + $0x1a8] sm:$0xff] %v273_v44  ;;  %338 = vst [vmem:[%s899_s3 + $0x1b0] sm:$0xff] %v274_v45  ;;  %v219_v5 = vadd.f32 %v385_v2, %v148_v59 }
  0x92   :  { %339 = vst [vmem:[%s899_s3 + $0x1b8] sm:$0xff] %v275_v48  ;;  %340 = vst [vmem:[%s899_s3 + $0x1c0] sm:$0xff] %v276_v60 }
  0x93   :  { %341 = vst [vmem:[%s899_s3 + $0x1c8] sm:$0xff] %v277_v0  ;;  %342 = vst [vmem:[%s899_s3 + $0x1d0] sm:$0xff] %v278_v3  ;;  %v283_v1 = vmax.f32 %v219_v5, 0.0 }
  0x94   :  { %343 = vst [vmem:[%s899_s3 + $0x1d8] sm:$0xff] %v279_v4  ;;  %344 = vst [vmem:[%s899_s3 + $0x1e0] sm:$0xff] %v280_v6 }
  0x95   :  { %345 = vst [vmem:[%s899_s3 + $0x1e8] sm:$0xff] %v281_v7  ;;  %346 = vst [vmem:[%s899_s3 + $0x1f0] sm:$0xff] %v282_v8 }
  0x96   :  { %347 = vst [vmem:[%s899_s3 + $0x1f8] sm:$0xff] %v283_v1 }

// kernel: conv_norm_act.2
= control target key start
LH: loop header
LB: loop body
LE: loop exit
PB: predicated region body
PF: predicated region fallthrough
CT: control target
= control target key end

     0   :  { %s3530_s12 = smov 0   ;;  %s4430_s0 = inlined_call_operand.vmem [shape: bf16[4,10,18,4], index: 0, kind: input, shape index: {}]   ;;  %s4431_s1 = inlined_call_operand.vmem [shape: bf16[9,4,128], index: 1, kind: input, shape index: {}]   ;;  %s4432_s2 = inlined_call_operand.vmem [shape: f32[4,128,128], index: 2, kind: output, shape index: {0}]   ;;  %s4433_s3 = inlined_call_operand.vmem [shape: f32[4,2,128], index: 3, kind: output, shape index: {1}]  }
   0x1 LB: > { %s2801_s13 = sadd.s32 4294967295, %s3508_s12   ;;  %p2805_p0 = scmp.ge.s32.totalorder %s3508_s12, 1  ;;  %s3508_s12 = sphi %s3530_s12, %s14_s12  }
   0x2   : > { %p140_p1 = scmp.lt.s32.totalorder %s3508_s12, 5 }
   0x4   : > { %p141_p2 = pnand %p2805_p0, %p140_p1 }
   0x6   : > { %144 = sbr.rel (%p141_p2) target bundleno = 434 (0x1b2), region = 28 }
   0xd   : > { %v2810_v0 = vld [vmem:[%s4431_s1 + $0x2] sm:$0x3]  ;;  %vm454_vm0 = vcmask 1041408   ;;  %v2925_v1 = vld [vmem:[%s4431_s1 + $0x8] sm:$0x3]  ;;  %p168_p3 = scmp.lt.s32.totalorder %s2801_s13, 3 }
   0xe   : > { %3458 = vmatprep.subr.msk.bf16.mxu1 %vm454_vm0, %v2810_v0  ;;  %3462 = vmatprep.subr.msk.bf16.mxu0 %vm454_vm0, %v2925_v1  ;;  %v456_v2 = vsel %vm454_vm0, %v2810_v0, 0  ;;  %v3548_v3 = vsel %vm454_vm0, %v2925_v1, 0  ;;  %v199_v4 = vld [vmem:[%s4431_s1] sm:$0x3]  ;;  %v2958_v5 = vld [vmem:[%s4431_s1 + $0xa] sm:$0x3] }
   0xf   : > { %3167 = vmatpush3.bf16.msra.mxu1 %v456_v2  ;;  %3239 = vmatpush3.bf16.msra.mxu0 %v3548_v3  ;;  %s4457_s13 = smov (!%p168_p3, %s2801_s13), 3  ;;  %vm208_vm1 = vsmask.f32 3328  ;;  %vm209_vm2 = vsmask.f32 7440  ;;  %vm429_vm3 = vcmask 31744  }
  0x10   : > { %3459 = vmatprep.subr.msk.bf16.mxu1 %vm454_vm0, %v199_v4  ;;  %3464 = vmatprep.subr.msk.bf16.mxu0 %vm454_vm0, %v2958_v5  ;;  %s3468_s22 = smul.u32 120, %s4457_s13  ;;  %v3589_v17 = vsel %vm454_vm0, %v199_v4, 0  ;;  %v3595_v26 = vld [vmem:[%s4431_s1 + $0xc] sm:$0x3]  ;;  %vm3604_vm4 = vmor %vm208_vm1, %vm209_vm2  ;;  %v3612_v37 = vsel %vm454_vm0, %v2958_v5, 0  ;;  %vm743_vm5 = vcmask 1042432  }
  0x11   : > { %v3616_v41 = vsel %vm454_vm0, %v3595_v26, 0  ;;  %vm744_vm6 = vcmask 1046532   ;;  %s3084_s11 = sshll.u32 %s4457_s13, 7  ;;  %s2809_s17 = sshll.u32 %s4457_s13, 1  ;;  %vm2712_vm8 = vcmask 1040384  }
  0x12   : > { %s3565_s25 = scalar_lea.vmem %s4430_s0, %s3468_s22  ;;  %vm3759_vm7 = vmor %vm743_vm5, %vm744_vm6  ;;  %s4405_s16 = scalar_lea.vmem %s4432_s2, %s3084_s11 }
  0x13   : > { %v3568_v6 = vld [vmem:[%s3565_s25] sm:$0xf]  ;;  %v3571_v7 = vld [vmem:[%s3565_s25 + $0x4] sm:$0xf]  ;;  %v3574_v8 = vld [vmem:[%s3565_s25 + $0x8] sm:$0x1]  ;;  %s181_s20 = scalar_lea.vmem %s4433_s3, %s2809_s17 }
  0x14   : > { %v212_v9 = vshrl.u32 %v3568_v6, 16  ;;  %v215_v10 = vshll.u32 %v3568_v6, 16  ;;  %v221_v11 = vshll.u32 %v3571_v7, 16  ;;  %v225_v12 = vshrl.u32 %v3571_v7, 16  ;;  %v2901_v13 = vld [vmem:[%s3565_s25 + $0xc] sm:$0xf] }
  0x15   : > { %v231_v14 = vshll.u32 %v3574_v8, 16  ;;  %v3583_v15 = vld [vmem:[%s3565_s25 + $0x10] sm:$0xf]  ;;  %v3586_v16 = vld [vmem:[%s3565_s25 + $0x14] sm:$0x1]  ;;  %v1192_v23 = vshrl.u32 %v2901_v13, 16 }
  0x16   : > { %v214_v18 = vrot.slane %v212_v9, 4  ;;  %v217_v19 = vrot.slane %v215_v10, 5  ;;  %v223_v20 = vrot.slane %v221_v11, 5  ;;  %v227_v21 = vrot.slane %v225_v12, 4  ;;  %v3600_v31 = vld [vmem:[%s3565_s25 + $0xc] sm:$0xf] }
  0x17   : > { %v233_v22 = vrot.slane %v231_v14, 5  ;;  %v1195_v24 = vshll.u32 %v2901_v13, 16  ;;  %v1201_v25 = vshll.u32 %v3583_v15, 16  ;;  %v1205_v29 = vshrl.u32 %v3583_v15, 16  ;;  %v3609_v36 = vld [vmem:[%s3565_s25 + $0x10] sm:$0xf] }
  0x18   : > { %v218_v27 = vor.u32 %v217_v19, %v214_v18  ;;  %v228_v28 = vor.u32 %v227_v21, %v223_v20  ;;  %v1211_v30 = vshll.u32 %v3586_v16, 16  ;;  %v1194_v33 = vrot.slane %v1192_v23, 4  ;;  %v3619_v44 = vld [vmem:[%s3565_s25 + $0x14] sm:$0x1]  ;;  %v2904_v55 = vld [vmem:[%s3565_s25 + $0x18] sm:$0xf] }
  0x19   : > { %v1197_v34 = vrot.slane %v1195_v24, 5  ;;  %v1203_v35 = vrot.slane %v1201_v25, 5  ;;  %v1207_v40 = vrot.slane %v1205_v29, 4  ;;  %v236_v45 = vshrl.u32 %v3600_v31, 16  ;;  %v3632_v60 = vld [vmem:[%s3565_s25 + $0x1c] sm:$0xf] }
  0x1a   : > { %v219_v38 = vrot.slane %v218_v27, 4  ;;  %v229_v39 = vrot.slane %v228_v28, 4  ;;  %v1213_v43 = vrot.slane %v1211_v30, 5  ;;  %v239_v46 = vshll.u32 %v3600_v31, 16  ;;  %v3640_v1 = vld [vmem:[%s3565_s25 + $0x20] sm:$0x1] }
  0x1b   : > { %v1198_v42 = vor.u32 %v1197_v34, %v1194_v33  ;;  %v1208_v49 = vor.u32 %v1207_v40, %v1203_v35  ;;  %v245_v50 = vshll.u32 %v3609_v36, 16  ;;  %v238_v53 = vrot.slane %v236_v45, 4  ;;  %v3648_v21 = vld [vmem:[%s3565_s25 + $0x18] sm:$0xf]  ;;  %v3655_v27 = vld [vmem:[%s3565_s25 + $0x1c] sm:$0xf] }
  0x1c   : > { %v224_v47 = vsel %vm3604_vm4, %v219_v38, %v223_v20  ;;  %v234_v48 = vsel %vm3604_vm4, %v229_v39, %v233_v22  ;;  %v241_v54 = vrot.slane %v239_v46, 5  ;;  %v249_v58 = vshrl.u32 %v3609_v36, 16  ;;  %v3663_v38 = vld [vmem:[%s3565_s25 + $0x20] sm:$0x1] }
  0x1d   : > { %v2811_v51 = vcombine.low %v224_v47, %v234_v48  ;;  %v1199_v52 = vrot.slane %v1198_v42, 4  ;;  %v1209_v56 = vrot.slane %v1208_v49, 4  ;;  %v247_v57 = vrot.slane %v245_v50, 5  ;;  %v2907_v47 = vld [vmem:[%s3565_s25 + $0x24] sm:$0xf] }
  0x1e   : > { %v255_v59 = vshll.u32 %v3619_v44, 16  ;;  %v1583_v62 = vrot.slane %v3583_v15, 5  ;;  %v1586_v63 = vrot.slane %v3586_v16, 5  ;;  %v242_v0 = vor.u32 %v241_v54, %v238_v53 }
  0x1f   : > { %3168 = vmatprep.mubr.msk.bf16.mxu1 %vm429_vm3, %v2811_v51  ;;  %v1204_v61 = vsel %vm3604_vm4, %v1199_v52, %v1203_v35  ;;  %v1214_v2 = vsel %vm3604_vm4, %v1209_v56, %v1213_v43  ;;  %v251_v4 = vrot.slane %v249_v58, 4  ;;  %v1216_v9 = vshrl.u32 %v2904_v55, 16  ;;  %v3673_v52 = vld [vmem:[%s3565_s25 + $0x28] sm:$0xf] }
  0x20   : > { %v257_v5 = vrot.slane %v255_v59, 5  ;;  %v2926_v10 = vcombine.low %v1204_v61, %v1214_v2  ;;  %v243_v11 = vrot.slane %v242_v0, 4  ;;  %v1219_v12 = vshll.u32 %v2904_v55, 16  ;;  %v3685_v61 = vld [vmem:[%s3565_s25 + $0x2c] sm:$0x1] }
  0x21   : > { %v1225_v13 = vshll.u32 %v3632_v60, 16  ;;  %v252_v14 = vor.u32 %v251_v4, %v247_v57  ;;  %v1218_v18 = vrot.slane %v1216_v9, 4  ;;  %v1229_v19 = vshrl.u32 %v3632_v60, 16 }
  0x22   : > { %v1235_v20 = vshll.u32 %v3640_v1, 16  ;;  %3240 = vmatprep.mubr.msk.bf16.mxu0 %vm429_vm3, %v2926_v10  ;;  %v248_v22 = vsel %vm3604_vm4, %v243_v11, %v247_v57  ;;  %v1221_v23 = vrot.slane %v1219_v12, 5  ;;  %v1590_v25 = vrot.slane %v3632_v60, 5  ;;  %v3679_v57 = vld [vmem:[%s4431_s1 + $0x4] sm:$0x3] }
  0x23   : > { %v1227_v24 = vrot.slane %v1225_v13, 5  ;;  %v253_v28 = vrot.slane %v252_v14, 4  ;;  %v1231_v29 = vrot.slane %v1229_v19, 4  ;;  %v1593_v33 = vrot.slane %v3640_v1, 5  ;;  %v3692_v11 = vld [vmem:[%s3565_s25 + $0x24] sm:$0xf] }
  0x24   : > { %v1237_v30 = vrot.slane %v1235_v20, 5  ;;  %v1222_v34 = vor.u32 %v1221_v23, %v1218_v18  ;;  %v3660_v35 = vrot.slane %v1590_v25, 4  ;;  %v260_v39 = vshrl.u32 %v3648_v21, 16  ;;  %v3695_v19 = vld [vmem:[%s3565_s25 + $0x28] sm:$0xf] }
  0x25   : > { %v263_v40 = vshll.u32 %v3648_v21, 16  ;;  %v258_v42 = vsel %vm3604_vm4, %v253_v28, %v257_v5  ;;  %v1232_v43 = vor.u32 %v1231_v29, %v1227_v24  ;;  %v269_v45 = vshll.u32 %v3655_v27, 16  ;;  %v3705_v29 = vld [vmem:[%s3565_s25 + $0x2c] sm:$0x1] }
  0x26   : > { %v273_v46 = vshrl.u32 %v3655_v27, 16  ;;  %v2812_v48 = vcombine.low %v248_v22, %v258_v42  ;;  %v1223_v49 = vrot.slane %v1222_v34, 4  ;;  %v262_v50 = vrot.slane %v260_v39, 4 }
  0x27   : > { %v265_v51 = vrot.slane %v263_v40, 5  ;;  %v1233_v53 = vrot.slane %v1232_v43, 4  ;;  %v271_v54 = vrot.slane %v269_v45, 5  ;;  %v279_v56 = vshll.u32 %v3663_v38, 16  ;;  %v2910_v45 = vld [vmem:[%s3565_s25 + $0x30] sm:$0xf] }
  0x28   : > { %v275_v55 = vrot.slane %v273_v46, 4  ;;  %3169 = vmatmul.mubr.msk.bf16.vlgmr.msra.gmra.mrb[0].mxu1 %vm429_vm3, %v2812_v48  ;;  %v1228_v58 = vsel %vm3604_vm4, %v1223_v49, %v1227_v24  ;;  %v1240_v0 = vshrl.u32 %v2907_v47, 16  ;;  %v1243_v2 = vshll.u32 %v2907_v47, 16 }
  0x29   : > { %v266_v59 = vor.u32 %v265_v51, %v262_v50  ;;  %3185 = vmatpush3.bf16.msra.mxu1 %v3589_v17  ;;  %v1238_v4 = vsel %vm3604_vm4, %v1233_v53, %v1237_v30  ;;  %v281_v9 = vrot.slane %v279_v56, 5  ;;  %v1249_v10 = vshll.u32 %v3673_v52, 16  ;;  %v3715_v50 = vld [vmem:[%s3565_s25 + $0x34] sm:$0xf] }
  0x2a   : > { %v276_v5 = vor.u32 %v275_v55, %v271_v54  ;;  %v2927_v12 = vcombine.low %v1228_v58, %v1238_v4  ;;  %v1242_v14 = vrot.slane %v1240_v0, 4  ;;  %v1245_v18 = vrot.slane %v1243_v2, 5  ;;  %3460 = vmatprep.subr.msk.bf16.mxu1 %vm454_vm0, %v3679_v57  ;;  %v3725_v58 = vld [vmem:[%s3565_s25 + $0x38] sm:$0x1] }
  0x2b   : > { %v267_v13 = vrot.slane %v266_v59, 4  ;;  %v1251_v20 = vrot.slane %v1249_v10, 5  ;;  %v1253_v22 = vshrl.u32 %v3673_v52, 16  ;;  %v1259_v23 = vshll.u32 %v3685_v61, 16 }
  0x2c   : > { %v277_v17 = vrot.slane %v276_v5, 4  ;;  %3241 = vmatmul.mubr.msk.bf16.vlgmr.msra.gmra.mrb[0].mxu0 %vm429_vm3, %v2927_v12  ;;  %v1246_v28 = vor.u32 %v1245_v18, %v1242_v14  ;;  %v284_v30 = vshrl.u32 %v3692_v11, 16  ;;  %v287_v34 = vshll.u32 %v3692_v11, 16  ;;  %v3730_v14 = vld [vmem:[%s3565_s25 + $0x30] sm:$0xf] }
  0x2d   : > { %v272_v24 = vsel %vm3604_vm4, %v267_v13, %v271_v54  ;;  %3257 = vmatpush3.bf16.msra.mxu0 %v3612_v37  ;;  %v1255_v40 = vrot.slane %v1253_v22, 4  ;;  %v1261_v42 = vrot.slane %v1259_v23, 5  ;;  %v293_v43 = vshll.u32 %v3695_v19, 16  ;;  %v3736_v23 = vld [vmem:[%s3565_s25 + $0x34] sm:$0xf] }
  0x2e   : > { %v282_v39 = vsel %vm3604_vm4, %v277_v17, %v281_v9  ;;  %v1247_v47 = vrot.slane %v1246_v28, 4  ;;  %v286_v48 = vrot.slane %v284_v30, 4  ;;  %v289_v49 = vrot.slane %v287_v34, 5  ;;  %3465 = vmatprep.subr.msk.bf16.mxu0 %vm454_vm0, %v3595_v26 }
  0x2f   : > { %v2813_v46 = vcombine.low %v272_v24, %v282_v39  ;;  %v1256_v37 = vor.u32 %v1255_v40, %v1251_v20  ;;  %v295_v51 = vrot.slane %v293_v43, 5  ;;  %v297_v53 = vshrl.u32 %v3695_v19, 16  ;;  %v3741_v39 = vld [vmem:[%s3565_s25 + $0x38] sm:$0x1] }
  0x30   : > { %v303_v54 = vshll.u32 %v3705_v29, 16  ;;  %v1252_v55 = vsel %vm3604_vm4, %v1247_v47, %v1251_v20  ;;  %v290_v56 = vor.u32 %v289_v49, %v286_v48  ;;  %v1264_v59 = vshrl.u32 %v2910_v45, 16 }
  0x31   : > { %3172 = vmatprep.mubr.msk.bf16.mxu1 %vm429_vm3, %v2813_v46  ;;  %v1267_v0 = vshll.u32 %v2910_v45, 16  ;;  %v1257_v2 = vrot.slane %v1256_v37, 4  ;;  %v299_v26 = vrot.slane %v297_v53, 4  ;;  %v1273_v5 = vshll.u32 %v3715_v50, 16  ;;  %v2942_v37 = vld [vmem:[%s3565_s25 + $0xc] sm:$0xe] }
  0x32   : > { %v305_v4 = vrot.slane %v303_v54, 5  ;;  %v291_v9 = vrot.slane %v290_v56, 4  ;;  %v1266_v10 = vrot.slane %v1264_v59, 4  ;;  %v1277_v13 = vshrl.u32 %v3715_v50, 16  ;;  %v3753_v56 = vld [vmem:[%s3565_s25 + $0x3c] sm:$0xf] }
  0x33   : > { %v1269_v12 = vrot.slane %v1267_v0, 5  ;;  %v1262_v18 = vsel %vm3604_vm4, %v1257_v2, %v1261_v42  ;;  %v300_v17 = vor.u32 %v299_v26, %v295_v51  ;;  %v1275_v20 = vrot.slane %v1273_v5, 5 }
  0x34   : > { %v1283_v22 = vshll.u32 %v3725_v58, 16  ;;  %v2928_v24 = vcombine.low %v1252_v55, %v1262_v18  ;;  %v296_v28 = vsel %vm3604_vm4, %v291_v9, %v295_v51  ;;  %v1279_v34 = vrot.slane %v1277_v13, 4  ;;  %v3767_v18 = vld [vmem:[%s3565_s25 + $0x44] sm:$0x1] }
  0x35   : > { %v1270_v30 = vor.u32 %v1269_v12, %v1266_v10  ;;  %v301_v40 = vrot.slane %v300_v17, 4  ;;  %v308_v42 = vshrl.u32 %v3730_v14, 16  ;;  %v311_v45 = vshll.u32 %v3730_v14, 16  ;;  %v2943_v17 = vld [vmem:[%s3565_s25 + $0x18] sm:$0xe] }
  0x36   : > { %v1285_v43 = vrot.slane %v1283_v22, 5  ;;  %3244 = vmatprep.mubr.msk.bf16.mxu0 %vm429_vm3, %v2928_v24  ;;  %v1280_v47 = vor.u32 %v1279_v34, %v1275_v20  ;;  %v317_v48 = vshll.u32 %v3736_v23, 16  ;;  %v321_v49 = vshrl.u32 %v3736_v23, 16 }
  0x37   : > { %v1271_v46 = vrot.slane %v1270_v30, 4  ;;  %v306_v51 = vsel %vm3604_vm4, %v301_v40, %v305_v4  ;;  %v310_v53 = vrot.slane %v308_v42, 4  ;;  %v313_v54 = vrot.slane %v311_v45, 5  ;;  %v3764_v4 = vld [vmem:[%s3565_s25 + $0x40] sm:$0xf] }
  0x38   : > { %v327_v55 = vshll.u32 %v3741_v39, 16  ;;  %v2814_v59 = vcombine.low %v296_v28, %v306_v51  ;;  %v1281_v2 = vrot.slane %v1280_v47, 4  ;;  %v319_v26 = vrot.slane %v317_v48, 5  ;;  %v3778_v30 = vld [vmem:[%s3565_s25 + $0x48] sm:$0xf] }
  0x39   : > { %v1276_v0 = vsel %vm3604_vm4, %v1271_v46, %v1275_v20  ;;  %v314_v9 = vor.u32 %v313_v54, %v310_v53  ;;  %v323_v10 = vrot.slane %v321_v49, 4  ;;  %v2950_v13 = vrot.slane %v2942_v37, 9 }
  0x3a   : > { %v329_v12 = vrot.slane %v327_v55, 5  ;;  %3173 = vmatmul.mubr.msk.bf16.gmra.mrb[4].mxu1 %vm429_vm3, %v2814_v59  ;;  %v1286_v20 = vsel %vm3604_vm4, %v1281_v2, %v1285_v43  ;;  %v1585_v22 = vrot.slane %v1583_v62, 4  ;;  %v332_v24 = vshrl.u32 %v3753_v56, 16  ;;  %v3798_v55 = vld [vmem:[%s3565_s25 + $0x50] sm:$0x1] }
  0x3b   : > { %v335_v28 = vshll.u32 %v3753_v56, 16  ;;  %v2929_v34 = vcombine.low %v1276_v0, %v1286_v20  ;;  %v315_v40 = vrot.slane %v314_v9, 4  ;;  %v324_v42 = vor.u32 %v323_v10, %v319_v26 }
  0x3c   : > { %v1584_v45 = vsel %vm3759_vm7, %v2950_v13, %v1583_v62  ;;  %v1587_v43 = vsel %vm3759_vm7, %v1585_v22, %v1586_v63  ;;  %v334_v46 = vrot.slane %v332_v24, 4  ;;  %v341_v48 = vshll.u32 %v3764_v4, 16  ;;  %v3794_v62 = vld [vmem:[%s3565_s25 + $0x4c] sm:$0xf] }
  0x3d   : > { %v337_v47 = vrot.slane %v335_v28, 5  ;;  %3245 = vmatmul.mubr.msk.bf16.gmra.mrb[4].mxu0 %vm429_vm3, %v2929_v34  ;;  %v320_v49 = vsel %vm3604_vm4, %v315_v40, %v319_v26  ;;  %v325_v37 = vrot.slane %v324_v42, 4  ;;  %v2959_v15 = vcombine.low %v1584_v45, %v1587_v43  ;;  %v3816_v28 = vld [vmem:[%s3565_s25 + $0x54] sm:$0xf]  ;;  %v3827_v34 = vld [vmem:[%s4431_s1 + $0xe] sm:$0x3] }
  0x3e   : > { %v345_v51 = vshrl.u32 %v3764_v4, 16  ;;  %v343_v53 = vrot.slane %v341_v48, 5  ;;  %v351_v63 = vshll.u32 %v3767_v18, 16  ;;  %v2951_v54 = vrot.slane %v2943_v17, 9 }
  0x3f   : > { %v338_v16 = vor.u32 %v337_v47, %v334_v46  ;;  %v330_v59 = vsel %vm3604_vm4, %v325_v37, %v329_v12  ;;  %3258 = vmatprep.mubr.msk.bf16.mxu0 %vm429_vm3, %v2959_v15  ;;  %v1594_v2 = vsel %vm3759_vm7, %v3660_v35, %v1593_v33  ;;  %v356_v26 = vshrl.u32 %v3778_v30, 16  ;;  %v2944_v12 = vld [vmem:[%s3565_s25 + $0x24] sm:$0xe]  ;;  %v3832_v37 = vld [vmem:[%s3565_s25 + $0x58] sm:$0xf] }
  0x40   : > { %v347_v0 = vrot.slane %v345_v51, 4  ;;  %v2815_v9 = vcombine.low %v320_v49, %v330_v59  ;;  %v353_v13 = vrot.slane %v351_v63, 5  ;;  %v1591_v17 = vsel %vm3759_vm7, %v2951_v54, %v1590_v25  ;;  %v3841_v54 = vld [vmem:[%s3565_s25 + $0x5c] sm:$0x1] }
  0x41   : > { %v339_v10 = vrot.slane %v338_v16, 4  ;;  %v2960_v22 = vcombine.low %v1591_v17, %v1594_v2  ;;  %v358_v24 = vrot.slane %v356_v26, 4  ;;  %v359_v1 = vshll.u32 %v3778_v30, 16 }
  0x42   : > { %v348_v20 = vor.u32 %v347_v0, %v343_v53  ;;  %3176 = vmatprep.mubr.msk.bf16.mxu1 %vm429_vm3, %v2815_v9  ;;  %v365_v35 = vshll.u32 %v3794_v62, 16  ;;  %v369_v60 = vshrl.u32 %v3794_v62, 16  ;;  %v375_v25 = vshll.u32 %v3798_v55, 16 }
  0x43   : > { %v344_v33 = vsel %vm3604_vm4, %v339_v10, %v343_v53  ;;  %v361_v42 = vrot.slane %v359_v1, 5  ;;  %v2952_v45 = vrot.slane %v2944_v12, 9  ;;  %v1597_v43 = vrot.slane %v3673_v52, 5  ;;  %v2945_v10 = vld [vmem:[%s3565_s25 + $0x30] sm:$0xe] }
  0x44   : > { %v349_v40 = vrot.slane %v348_v20, 4  ;;  %v367_v46 = vrot.slane %v365_v35, 5  ;;  %v371_v47 = vrot.slane %v369_v60, 4  ;;  %v377_v48 = vrot.slane %v375_v25, 5 }
  0x45   : > { %v1600_v49 = vrot.slane %v3685_v61, 5  ;;  %3259 = vmatmul.mubr.msk.bf16.vlgmr.msra.gmra.mrb[0].mxu0 %vm429_vm3, %v2960_v22  ;;  %v362_v51 = vor.u32 %v361_v42, %v358_v24  ;;  %v1598_v16 = vsel %vm3759_vm7, %v2952_v45, %v1597_v43  ;;  %v1599_v53 = vrot.slane %v1597_v43, 4  ;;  %v3862_v42 = vld [vmem:[%s3565_s25 + $0x40] sm:$0xf]  ;;  %v3865_v45 = vld [vmem:[%s3565_s25 + $0x44] sm:$0x1] }
  0x46   : > { %v354_v15 = vsel %vm3604_vm4, %v349_v40, %v353_v13  ;;  %3275 = vmatpush3.bf16.msra.mxu0 %v3616_v41  ;;  %v372_v52 = vor.u32 %v371_v47, %v367_v46  ;;  %v380_v61 = vshrl.u32 %v3816_v28, 16  ;;  %v383_v59 = vshll.u32 %v3816_v28, 16 }
  0x47   : > { %v2816_v63 = vcombine.low %v344_v33, %v354_v15  ;;  %v363_v0 = vrot.slane %v362_v51, 4  ;;  %v1601_v2 = vsel %vm3759_vm7, %v1599_v53, %v1600_v49  ;;  %v389_v26 = vshll.u32 %v3832_v37, 16  ;;  %3466 = vmatprep.subr.msk.bf16.mxu0 %vm454_vm0, %v3827_v34  ;;  %v2946_v33 = vld [vmem:[%s3565_s25 + $0x3c] sm:$0xe] }
  0x48   : > { %v393_v9 = vshrl.u32 %v3832_v37, 16  ;;  %v373_v41 = vrot.slane %v372_v52, 4  ;;  %v2961_v13 = vcombine.low %v1598_v16, %v1601_v2  ;;  %v382_v17 = vrot.slane %v380_v61, 4  ;;  %v2947_v2 = vld [vmem:[%s3565_s25 + $0x48] sm:$0xe] }
  0x49   : > { %3177 = vmatmul.mubr.msk.bf16.gmra.mrb[8].mxu1 %vm429_vm3, %v2816_v63  ;;  %v385_v12 = vrot.slane %v383_v59, 5  ;;  %v368_v20 = vsel %vm3604_vm4, %v363_v0, %v367_v46  ;;  %v391_v22 = vrot.slane %v389_v26, 5  ;;  %v399_v1 = vshll.u32 %v3841_v54, 16  ;;  %v3880_v59 = vld [vmem:[%s3565_s25 + $0x4c] sm:$0xf] }
  0x4a   : > { %v395_v24 = vrot.slane %v393_v9, 4  ;;  %v378_v35 = vsel %vm3604_vm4, %v373_v41, %v377_v48  ;;  %3262 = vmatprep.mubr.msk.bf16.mxu0 %vm429_vm3, %v2961_v13  ;;  %v2953_v25 = vrot.slane %v2945_v10, 9  ;;  %v1604_v40 = vrot.slane %v3715_v50, 5  ;;  %v3883_v0 = vld [vmem:[%s3565_s25 + $0x50] sm:$0x1] }
  0x4b   : > { %v386_v60 = vor.u32 %v385_v12, %v382_v17  ;;  %v2817_v43 = vcombine.low %v368_v20, %v378_v35  ;;  %v401_v47 = vrot.slane %v399_v1, 5  ;;  %v1607_v49 = vrot.slane %v3725_v58, 5  ;;  %v3891_v17 = vld [vmem:[%s3565_s25 + $0x58] sm:$0xf]  ;;  %v3894_v12 = vld [vmem:[%s3565_s25 + $0x5c] sm:$0x1] }
  0x4c   : > { %v396_v46 = vor.u32 %v395_v24, %v391_v22  ;;  %v1605_v48 = vsel %vm3759_vm7, %v2953_v25, %v1604_v40  ;;  %v1606_v51 = vrot.slane %v1604_v40, 4  ;;  %v2954_v16 = vrot.slane %v2946_v33, 9  ;;  %4443 = vst [vmem:[#allocation2_spill] sm:$0xff] %v3894_v12  ;;  %v3904_v35 = vld [vmem:[%s3565_s25 + $0x64] sm:$0xf] }
  0x4d   : > { %v387_v15 = vrot.slane %v386_v60, 4  ;;  %3180 = vmatprep.mubr.msk.bf16.mxu1 %vm429_vm3, %v2817_v43  ;;  %v1611_v53 = vrot.slane %v3862_v42, 5  ;;  %v1614_v63 = vrot.slane %v3865_v45, 5  ;;  %v2827_v61 = vcombine.low %v3568_v6, %v3571_v7  ;;  %v2948_v6 = vld [vmem:[%s3565_s25 + $0x54] sm:$0xe]  ;;  %4444 = vst [vmem:[#allocation3_spill] sm:$0xff] %v3904_v35 }
  0x4e   : > { %v397_v50 = vrot.slane %v396_v46, 4  ;;  %v1608_v58 = vsel %vm3759_vm7, %v1606_v51, %v1607_v49  ;;  %v1618_v24 = vrot.slane %v3880_v59, 5  ;;  %v1621_v1 = vrot.slane %v3883_v0, 5  ;;  %v3907_v60 = vld [vmem:[%s3565_s25 + $0x68] sm:$0x1] }
  0x4f   : > { %v392_v52 = vsel %vm3604_vm4, %v387_v15, %v391_v22  ;;  %v2962_v9 = vcombine.low %v1605_v48, %v1608_v58  ;;  %v1612_v10 = vsel %vm3759_vm7, %v2954_v16, %v1611_v53  ;;  %v1613_v41 = vrot.slane %v1611_v53, 4  ;;  %4445 = vst [vmem:[#allocation4_spill] sm:$0xff] %v3907_v60 }
  0x50   : > { %v402_v26 = vsel %vm3604_vm4, %v397_v50, %v401_v47  ;;  %v2955_v22 = vrot.slane %v2947_v2, 9  ;;  %v1620_v40 = vrot.slane %v1618_v24, 4  ;;  %v2956_v43 = vrot.slane %v2948_v6, 9  ;;  %v2949_v47 = vld [vmem:[%s3565_s25 + $0x60] sm:$0xe] }
  0x51   : > { %v2818_v13 = vcombine.low %v392_v52, %v402_v26  ;;  %3263 = vmatmul.mubr.msk.bf16.gmra.mrb[4].mxu0 %vm429_vm3, %v2962_v9  ;;  %v1615_v20 = vsel %vm3759_vm7, %v1613_v41, %v1614_v63  ;;  %v1625_v46 = vrot.slane %v3891_v17, 5  ;;  %v755_v49 = vrot.slane %v3609_v36, 5  ;;  %v721_v2 = vld [vmem:[%s3565_s25 + $0x18] sm:$0xe]  ;;  %v3939_v6 = vld [vmem:[%s4431_s1 + $0x6] sm:$0x3] }
  0x52   : > { %v2963_v33 = vcombine.low %v1612_v10, %v1615_v20  ;;  %v1619_v25 = vsel %vm3759_vm7, %v2955_v22, %v1618_v24  ;;  %v1628_v15 = vrot.slane %v3894_v12, 5  ;;  %v1622_v48 = vsel %vm3759_vm7, %v1620_v40, %v1621_v1  ;;  %v723_v1 = vld [vmem:[%s3565_s25 + $0x30] sm:$0xe] }
  0x53   : > { %3181 = vmatmul.mubr.msk.bf16.gmra.mrb[12].mxu1 %vm429_vm3, %v2818_v13  ;;  %v1626_v51 = vsel %vm3759_vm7, %v2956_v43, %v1625_v46  ;;  %v1627_v16 = vrot.slane %v1625_v46, 4  ;;  %v1632_v50 = vrot.slane %v3904_v35, 5  ;;  %v2828_v53 = vcombine.low %v3600_v31, %v3609_v36  ;;  %v722_v36 = vld [vmem:[%s3565_s25 + $0x24] sm:$0xe]  ;;  %v4213_v12 = vld [vmem:[%s3565_s25 + $0x70] sm:$0xf] }
  0x54   : > { %3186 = vmatprep.mubr.msk.bf16.mxu1 %vm429_vm3, %v2827_v61  ;;  %3266 = vmatprep.mubr.msk.bf16.mxu0 %vm429_vm3, %v2963_v33  ;;  %v2964_v63 = vcombine.low %v1619_v25, %v1622_v48  ;;  %v2957_v52 = vrot.slane %v2949_v47, 9  ;;  %v1635_v58 = vrot.slane %v3907_v60, 5  ;;  %v720_v61 = vld [vmem:[%s3565_s25 + $0xc] sm:$0xe]  ;;  %v758_v26 = vrot.slane %v3619_v44, 5 }
  0x55   : > { %v2829_v9 = vcombine.low %v3648_v21, %v3655_v27  ;;  %v1629_v10 = vsel %vm3759_vm7, %v1627_v16, %v1628_v15  ;;  %v1634_v41 = vrot.slane %v1632_v50, 4  ;;  %v853_v13 = vsel %vm454_vm0, %v3679_v57, 0  ;;  %v3482_v16 = vld [vmem:[%s3565_s25 + $0x18] sm:$0xff]   ;;  %v4185_v60 = vld [vmem:[%s3565_s25 + $0x64] sm:$0xf] }
  0x56   : > { %v2965_v31 = vcombine.low %v1626_v51, %v1629_v10  ;;  %v2844_v44 = vrot.slane %v720_v61, 9  ;;  %v757_v20 = vrot.slane %v755_v49, 4  ;;  %v2845_v21 = vrot.slane %v721_v2, 9  ;;  %4446 = vst [vmem:[#allocation5_spill] sm:$0xff] %v4185_v60 }
  0x57   : > { %v1633_v22 = vsel %vm3759_vm7, %v2957_v52, %v1632_v50  ;;  %v1636_v57 = vsel %vm3759_vm7, %v1634_v41, %v1635_v58  ;;  %v762_v24 = vrot.slane %v3655_v27, 5  ;;  %v765_v40 = vrot.slane %v3663_v38, 5 }
  0x58   : > { %v3952_v33 = vsel %vm3759_vm7, %v2844_v44, %v755_v49  ;;  %v3956_v25 = vsel %vm3759_vm7, %v757_v20, %v758_v26  ;;  %v2846_v43 = vrot.slane %v722_v36, 9  ;;  %v2966_v49 = vcombine.low %v1633_v22, %v1636_v57  ;;  %v3008_v26 = vld [vmem:[%s3565_s25 + $0x18] sm:$0xf]  ;;  %v3484_v57 = vld [vmem:[%s3565_s25 + $0x24] sm:$0xff]  }
  0x59   : > { %3267 = vmatmul.mubr.msk.bf16.gmra.mrb[8].mxu0 %vm429_vm3, %v2964_v63  ;;  %v2853_v27 = vcombine.low %v3952_v33, %v3956_v25  ;;  %v3965_v46 = vsel %vm3759_vm7, %v2845_v21, %v762_v24  ;;  %v764_v47 = vrot.slane %v762_v24, 4  ;;  %v769_v15 = vrot.slane %v3695_v19, 5 }
  0x5a   : > { %3270 = vmatprep.mubr.msk.bf16.mxu0 %vm429_vm3, %v2965_v31  ;;  %v772_v48 = vrot.slane %v3705_v29, 5  ;;  %v2847_v38 = vrot.slane %v723_v1, 9  ;;  %v2830_v51 = vcombine.low %v3692_v11, %v3695_v19  ;;  %v779_v63 = vrot.slane %v3741_v39, 5  ;;  %v724_v19 = vld [vmem:[%s3565_s25 + $0x3c] sm:$0xe] }
  0x5b   : > { %3187 = vmatmul.mubr.msk.bf16.vlgmr.msra.gmra.mrb[0].mxu1 %vm429_vm3, %v2828_v53  ;;  %v3974_v50 = vsel %vm3759_vm7, %v764_v47, %v765_v40  ;;  %v776_v53 = vrot.slane %v3736_v23, 5  ;;  %v2831_v52 = vcombine.low %v3730_v14, %v3736_v23  ;;  %v3984_v58 = vsel %vm3759_vm7, %v2846_v43, %v769_v15  ;;  %v719_v14 = vld [vmem:[%s3565_s25] sm:$0xe]  ;;  %v4012_v31 = vld [vmem:[%s3565_s25 + $0x1c] sm:$0xf] }
  0x5c   : > { %3203 = vmatpush3.bf16.msra.mxu1 %v853_v13  ;;  %3190 = vmatprep.mubr.msk.bf16.mxu1 %vm429_vm3, %v2829_v9  ;;  %v2854_v29 = vcombine.low %v3965_v46, %v3974_v50  ;;  %v771_v11 = vrot.slane %v769_v15, 4  ;;  %v748_v61 = vrot.slane %v3571_v7, 5  ;;  %v2848_v10 = vrot.slane %v724_v19, 9  ;;  %v725_v1 = vld [vmem:[%s3565_s25 + $0x48] sm:$0xe] }
  0x5d   : > { %3461 = vmatprep.subr.msk.bf16.mxu1 %vm454_vm0, %v3939_v6  ;;  %v3990_v2 = vsel %vm3759_vm7, %v2847_v38, %v776_v53  ;;  %v778_v39 = vrot.slane %v776_v53, 4  ;;  %v751_v41 = vrot.slane %v3574_v8, 5  ;;  %v2843_v36 = vrot.slane %v719_v14, 9  ;;  %v4038_v38 = vld [vmem:[%s4431_s1 + $0x10] sm:$0x3] }
  0x5e   : > { %v3996_v23 = vsel %vm3759_vm7, %v771_v11, %v772_v48  ;;  %v750_v44 = vrot.slane %v748_v61, 4  ;;  %v783_v20 = vrot.slane %v3764_v4, 5  ;;  %v786_v21 = vrot.slane %v3767_v18, 5  ;;  %v4059_v14 = vld [vmem:[%s3565_s25 + $0x28] sm:$0xf] }
  0x5f   : > { %v4005_v9 = vsel %vm3759_vm7, %v778_v39, %v779_v63  ;;  %v2832_v22 = vcombine.low %v3753_v56, %v3764_v4  ;;  %v2027_v24 = vshrl.u32 %v3008_v26, 16  ;;  %v2030_v8 = vshll.u32 %v3008_v26, 16  ;;  %v3486_v4 = vld [vmem:[%s3565_s25 + $0x30] sm:$0xff]   ;;  %v4161_v46 = vld [vmem:[%s3565_s25 + $0x44] sm:$0x1] }
  0x60   : > { %v2036_v40 = vshll.u32 %v4012_v31, 16  ;;  %v2040_v43 = vshrl.u32 %v4012_v31, 16  ;;  %v4024_v47 = vsel %vm3759_vm7, %v2848_v10, %v783_v20  ;;  %v2269_v18 = vsel %vm454_vm0, %v3827_v34, 0  ;;  %v3026_v7 = vld [vmem:[%s3565_s25 + $0x60] sm:$0xf] }
  0x61   : > { %3271 = vmatmul.mubr.msk.bf16.gmra.mrb[12].mxu0 %vm429_vm3, %v2966_v49  ;;  %v785_v49 = vrot.slane %v783_v20, 4  ;;  %v2833_v56 = vcombine.low %v3778_v30, %v3794_v62  ;;  %v749_v15 = vsel %vm3759_vm7, %v2843_v36, %v748_v61  ;;  %v752_v48 = vsel %vm3759_vm7, %v750_v44, %v751_v41  ;;  %v4046_v30 = vld [vmem:[%s3565_s25 + $0x20] sm:$0x1]  ;;  %v3011_v61 = vld [vmem:[%s3565_s25 + $0x24] sm:$0xf] }
  0x62   : > { %3276 = vmatprep.mubr.msk.bf16.mxu0 %vm429_vm3, %v3482_v16  ;;  %v2849_v34 = vrot.slane %v725_v1, 9  ;;  %v2029_v16 = vrot.slane %v2027_v24, 4  ;;  %v2032_v53 = vrot.slane %v2030_v8, 5  ;;  %v4052_v11 = vrot.slane %v2036_v40, 5  ;;  %v726_v44 = vld [vmem:[%s3565_s25 + $0x54] sm:$0xe] }
  0x63   : > { %3191 = vmatmul.mubr.msk.bf16.gmra.mrb[4].mxu1 %vm429_vm3, %v2830_v51  ;;  %v4042_v51 = vsel %vm3759_vm7, %v785_v49, %v786_v21  ;;  %v2042_v19 = vrot.slane %v2040_v43, 4  ;;  %v793_v39 = vrot.slane %v3798_v55, 5  ;;  %v2834_v10 = vcombine.low %v3816_v28, %v3832_v37  ;;  %v3014_v55 = vld [vmem:[%s3565_s25 + $0x30] sm:$0xf]  ;;  %v3488_v20 = vld [vmem:[%s3565_s25 + $0x3c] sm:$0xff]   ;;  %v3489_v1 = vld [vmem:[%s3565_s25 + $0x48] sm:$0xff]  }
  0x64   : > { %3194 = vmatprep.mubr.msk.bf16.mxu1 %vm429_vm3, %v2831_v52  ;;  %v790_v52 = vrot.slane %v3794_v62, 5  ;;  %v2852_v41 = vcombine.low %v749_v15, %v752_v48  ;;  %v2046_v36 = vshll.u32 %v4046_v30, 16  ;;  %v2033_v21 = vor.u32 %v2032_v53, %v2029_v16  ;;  %v4078_v8 = vld [vmem:[%s3565_s25 + $0x34] sm:$0xf] }
  0x65   : > { %v2043_v28 = vor.u32 %v2042_v19, %v4052_v11  ;;  %v2060_v40 = vshll.u32 %v4059_v14, 16  ;;  %v2064_v43 = vshrl.u32 %v4059_v14, 16  ;;  %v797_v15 = vrot.slane %v3832_v37, 5 }
  0x66   : > { %v4063_v62 = vsel %vm3759_vm7, %v2849_v34, %v790_v52  ;;  %v792_v26 = vrot.slane %v790_v52, 4  ;;  %v2084_v48 = vshll.u32 %v4078_v8, 16  ;;  %v2088_v34 = vshrl.u32 %v4078_v8, 16 }
  0x67   : > { %v800_v16 = vrot.slane %v3841_v54, 5  ;;  %v2034_v53 = vrot.slane %v2033_v21, 4  ;;  %v2048_v52 = vrot.slane %v2046_v36, 5  ;;  %v2044_v37 = vrot.slane %v2043_v28, 4  ;;  %v4101_v36 = vld [vmem:[%s3565_s25 + $0x2c] sm:$0x1] }
  0x68   : > { %v4075_v24 = vsel %vm3759_vm7, %v792_v26, %v793_v39  ;;  %v4097_v26 = vrot.slane %v2060_v40, 5  ;;  %v4108_v21 = vld [vmem:[%s3565_s25 + $0x38] sm:$0x1]  ;;  %v1052_v28 = vsel %vm454_vm0, %v3939_v6, 0 }
  0x69   : > { %3277 = vmatmul.mubr.msk.bf16.vlgmr.msra.gmra.mrb[0].mxu0 %vm429_vm3, %v3484_v57  ;;  %v2054_v57 = vshll.u32 %v3011_v61, 16  ;;  %v3490_v40 = vld [vmem:[%s3565_s25 + $0x54] sm:$0xff]  }
  0x6a   : > { %3293 = vmatpush3.bf16.msra.mxu0 %v2269_v18  ;;  %3280 = vmatprep.mubr.msk.bf16.mxu0 %vm429_vm3, %v3486_v4  ;;  %v2075_v18 = vshrl.u32 %v3014_v55, 16  ;;  %v2850_v4 = vrot.slane %v726_v44, 9 }
  0x6b   : > { %3195 = vmatmul.mubr.msk.bf16.gmra.mrb[8].mxu1 %vm429_vm3, %v2832_v22  ;;  %3467 = vmatprep.subr.msk.bf16.mxu0 %vm454_vm0, %v4038_v38  ;;  %v2051_v22 = vshrl.u32 %v3011_v61, 16  ;;  %v799_v61 = vrot.slane %v797_v15, 4  ;;  %v2056_v54 = vrot.slane %v2054_v57, 5  ;;  %v2090_v57 = vrot.slane %v2088_v34, 4  ;;  %v3020_v34 = vld [vmem:[%s3565_s25 + $0x48] sm:$0xf] }
  0x6c   : > { %3198 = vmatprep.mubr.msk.bf16.mxu1 %vm429_vm3, %v2833_v56  ;;  %v2078_v56 = vshll.u32 %v3014_v55, 16  ;;  %v4093_v19 = vsel %vm3759_vm7, %v2850_v4, %v797_v15  ;;  %v2066_v55 = vrot.slane %v2064_v43, 4  ;;  %v2077_v44 = vrot.slane %v2075_v18, 4  ;;  %v4119_v43 = vld [vmem:[%s3565_s25 + $0x40] sm:$0xf] }
  0x6d   : > { %v2053_v39 = vrot.slane %v2051_v22, 4  ;;  %v4110_v22 = vrot.slane %v2084_v48, 5  ;;  %v3491_v18 = vld [vmem:[%s3565_s25 + $0x60] sm:$0xff]   ;;  %v2049_v4 = vsel %vm3604_vm4, %v2044_v37, %v2048_v52  ;;  %v2070_v48 = vshll.u32 %v4101_v36, 16 }
  0x6e   : > { %v2123_v52 = vshrl.u32 %v3020_v34, 16  ;;  %v2126_v37 = vshll.u32 %v3020_v34, 16 }
  0x6f   : > { %v2057_v15 = vor.u32 %v2056_v54, %v2053_v39  ;;  %v2091_v63 = vor.u32 %v2090_v57, %v4110_v22  ;;  %v3023_v57 = vld [vmem:[%s3565_s25 + $0x54] sm:$0xf] }
  0x70   : > { %v2125_v50 = vrot.slane %v2123_v52, 4  ;;  %v2150_v34 = vshll.u32 %v3023_v57, 16 }
  0x71   : > { %3281 = vmatmul.mubr.msk.bf16.gmra.mrb[4].mxu0 %vm429_vm3, %v3488_v20  ;;  %v2080_v20 = vrot.slane %v2078_v56, 5  ;;  %v2039_v56 = vsel %vm3604_vm4, %v2034_v53, %v4052_v11  ;;  %v2108_v11 = vshll.u32 %v4119_v43, 16  ;;  %v2112_v53 = vshrl.u32 %v4119_v43, 16 }
  0x72   : > { %3284 = vmatprep.mubr.msk.bf16.mxu0 %vm429_vm3, %v3489_v1  ;;  %v2094_v1 = vshll.u32 %v4108_v21, 16  ;;  %v3033_v54 = vcombine.low %v2039_v56, %v2049_v4  ;;  %v2092_v56 = vrot.slane %v2091_v63, 4  ;;  %v4166_v63 = vld [vmem:[%s3565_s25 + $0x50] sm:$0x1] }
  0x73   : > { %3199 = vmatmul.mubr.msk.bf16.gmra.mrb[12].mxu1 %vm429_vm3, %v2834_v10  ;;  %v4105_v10 = vsel %vm3759_vm7, %v799_v61, %v800_v16  ;;  %v4130_v16 = vld [vmem:[%s3565_s25 + $0x4c] sm:$0xf]  ;;  %v2067_v61 = vor.u32 %v2066_v55, %v4097_v26  ;;  %v2081_v6 = vor.u32 %v2080_v20, %v2077_v44  ;;  %v2058_v55 = vrot.slane %v2057_v15, 4 }
  0x74   : > { %3204 = vmatprep.mubr.msk.bf16.mxu1 %vm429_vm3, %v2852_v41  ;;  %v3017_v41 = vld [vmem:[%s3565_s25 + $0x3c] sm:$0xf]  ;;  %v2132_v39 = vshll.u32 %v4130_v16, 16  ;;  %v2072_v44 = vrot.slane %v2070_v48, 5  ;;  %v2136_v20 = vshrl.u32 %v4130_v16, 16  ;;  %v2096_v33 = vrot.slane %v2094_v1, 5 }
  0x75   : > { %v2099_v49 = vshrl.u32 %v3017_v41, 16  ;;  %v2102_v13 = vshll.u32 %v3017_v41, 16  ;;  %v2068_v41 = vrot.slane %v2067_v61, 4  ;;  %v4154_v15 = vrot.slane %v2108_v11, 5 }
  0x76   : > { %v2114_v48 = vrot.slane %v2112_v53, 4  ;;  %v2147_v1 = vshrl.u32 %v3023_v57, 16  ;;  %v1321_v11 = vshll.u32 %v3880_v59, 16  ;;  %v2063_v53 = vsel %vm3604_vm4, %v2058_v55, %v4097_v26 }
  0x77   : > { %v2101_v25 = vrot.slane %v2099_v49, 4  ;;  %v2104_v4 = vrot.slane %v2102_v13, 5  ;;  %v4163_v49 = vrot.slane %v2132_v39, 5  ;;  %v2138_v13 = vrot.slane %v2136_v20, 4 }
  0x78   : > { %v2073_v52 = vsel %vm3604_vm4, %v2068_v41, %v2072_v44  ;;  %v2115_v57 = vor.u32 %v2114_v48, %v4154_v15  ;;  %v2097_v26 = vsel %vm3604_vm4, %v2092_v56, %v2096_v33  ;;  %v2149_v44 = vrot.slane %v2147_v1, 4  ;;  %v4204_v56 = vld [vmem:[%s3565_s25 + $0x5c] sm:$0x1] }
  0x79   : > { %3285 = vmatmul.mubr.msk.bf16.gmra.mrb[8].mxu0 %vm429_vm3, %v3490_v40  ;;  %v2082_v40 = vrot.slane %v2081_v6, 4  ;;  %v2105_v20 = vor.u32 %v2104_v4, %v2101_v25  ;;  %v2139_v41 = vor.u32 %v2138_v13, %v4163_v49  ;;  %v4448_v33 = vcombine.low %v3990_v2, %v4005_v9 }
  0x7a   : > { %3288 = vmatprep.mubr.msk.bf16.mxu0 %vm429_vm3, %v3491_v18  ;;  %v3492_v18 = vld [vmem:[%s3565_s25 + $0x6c] sm:$0xff]   ;;  %v2171_v4 = vshrl.u32 %v3026_v7, 16  ;;  %v1325_v48 = vshrl.u32 %v3880_v59, 16  ;;  %v3034_v13 = vcombine.low %v2063_v53, %v2073_v52 }
  0x7b   : > { %3205 = vmatmul.mubr.msk.bf16.vlgmr.msra.gmra.mrb[0].mxu1 %vm429_vm3, %v2853_v27  ;;  %v4151_v27 = vld [vmem:[%s3565_s25 + $0x58] sm:$0xf]  ;;  %v2087_v39 = vsel %vm3604_vm4, %v2082_v40, %v4110_v22  ;;  %v4447_v22 = vcombine.low %v3984_v58, %v3996_v23  ;;  %v2152_v40 = vrot.slane %v2150_v34, 5  ;;  %v2174_v58 = vshll.u32 %v3026_v7, 16 }
  0x7c   : > { %3221 = vmatpush3.bf16.msra.mxu1 %v1052_v28  ;;  %3208 = vmatprep.mubr.msk.bf16.mxu1 %vm429_vm3, %v2854_v29  ;;  %v3501_v28 = vld [vmem:[%s4431_s1 + $0x8] sm:$0x3]  ;;  %v2128_v29 = vrot.slane %v2126_v37, 5  ;;  %v2156_v61 = vshll.u32 %v4151_v27, 16  ;;  %v2160_v6 = vshrl.u32 %v4151_v27, 16  ;;  %v2523_v37 = vsel %vm454_vm0, %v4038_v38, 0 }
  0x7d   : > { %3463 = vmatprep.subr.msk.bf16.mxu1 %vm454_vm0, %v3501_v28  ;;  %v2118_v28 = vshll.u32 %v4161_v46, 16  ;;  %v2142_v38 = vshll.u32 %v4166_v63, 16  ;;  %v2180_v23 = vshll.u32 %v4185_v60, 16  ;;  %v3035_v34 = vcombine.low %v2087_v39, %v2097_v26 }
  0x7e   : > { %v2129_v55 = vor.u32 %v2128_v29, %v2125_v50  ;;  %v4197_v25 = vrot.slane %v2156_v61, 5  ;;  %v2106_v50 = vrot.slane %v2105_v20, 4  ;;  %v2116_v29 = vrot.slane %v2115_v57, 4 }
  0x7f   : > { %v2120_v1 = vrot.slane %v2118_v28, 5  ;;  %v2144_v9 = vrot.slane %v2142_v38, 5  ;;  %v2140_v61 = vrot.slane %v2139_v41, 4  ;;  %v2166_v7 = vshll.u32 %v4204_v56, 16  ;;  %v4225_v28 = vld [vmem:[%s3565_s25 + $0x68] sm:$0x1] }
  0x80   : > { %v2130_v2 = vrot.slane %v2129_v55, 4  ;;  %v2173_v35 = vrot.slane %v2171_v4, 4  ;;  %v4215_v59 = vrot.slane %v2180_v23, 5  ;;  %v4217_v57 = vrot.slane %v1321_v11, 5 }
  0x81   : > { %3289 = vmatmul.mubr.msk.bf16.gmra.mrb[12].mxu0 %vm429_vm3, %v3492_v18  ;;  %v2162_v18 = vrot.slane %v2160_v6, 4  ;;  %v2153_v6 = vor.u32 %v2152_v40, %v2149_v44  ;;  %v1327_v53 = vrot.slane %v1325_v48, 4  ;;  %v2111_v52 = vsel %vm3604_vm4, %v2106_v50, %v4154_v15 }
  0x82   : > { %3294 = vmatprep.mubr.msk.bf16.mxu0 %vm429_vm3, %v3033_v54  ;;  %v2184_v54 = vshrl.u32 %v4185_v60, 16  ;;  %v2176_v60 = vrot.slane %v2174_v58, 5  ;;  %v2121_v39 = vsel %vm3604_vm4, %v2116_v29, %v2120_v1  ;;  %v2204_v38 = vshll.u32 %v4213_v12, 16  ;;  %v3493_v1 = vld [vmem:[%s3565_s25 + $0xc] sm:$0xff]  }
  0x83   : > { %3209 = vmatmul.mubr.msk.bf16.gmra.mrb[4].mxu1 %vm429_vm3, %v4447_v22  ;;  %v2163_v22 = vor.u32 %v2162_v18, %v4197_v25  ;;  %v2208_v44 = vshrl.u32 %v4213_v12, 16  ;;  %v4449_v11 = vcombine.low %v4024_v47, %v4042_v51  ;;  %v2135_v15 = vsel %vm3604_vm4, %v2130_v2, %v4163_v49 }
  0x84   : > { %3212 = vmatprep.mubr.msk.bf16.mxu1 %vm429_vm3, %v4448_v33  ;;  %v3029_v33 = vld [vmem:[%s3565_s25 + $0x6c] sm:$0xf]  ;;  %v2186_v20 = vrot.slane %v2184_v54, 4  ;;  %v2145_v41 = vsel %vm3604_vm4, %v2140_v61, %v2144_v9  ;;  %v2154_v40 = vrot.slane %v2153_v6, 4  ;;  %v2168_v18 = vrot.slane %v2166_v7, 5 }
  0x85   : > { %v2195_v26 = vshrl.u32 %v3029_v33, 16  ;;  %v2198_v55 = vshll.u32 %v3029_v33, 16  ;;  %v4450_v4 = vcombine.low %v4063_v62, %v4075_v24  ;;  %v2164_v47 = vrot.slane %v2163_v22, 4  ;;  %v2916_v22 = vld [vmem:[%s3565_s25 + $0x48] sm:$0xf] }
  0x86   : > { %v2177_v51 = vor.u32 %v2176_v60, %v2173_v35  ;;  %v2190_v49 = vshll.u32 %v4225_v28, 16  ;;  %v1328_v58 = vor.u32 %v1327_v53, %v4217_v57  ;;  %v1331_v23 = vshll.u32 %v3883_v0, 16  ;;  %v4254_v60 = vld [vmem:[%s3565_s25 + $0x74] sm:$0x1] }
  0x87   : > { %v3036_v54 = vcombine.low %v2111_v52, %v2121_v39  ;;  %v2197_v48 = vrot.slane %v2195_v26, 4  ;;  %v2200_v62 = vrot.slane %v2198_v55, 5  ;;  %v4248_v24 = vrot.slane %v2204_v38, 5 }
  0x88   : > { %v2210_v50 = vrot.slane %v2208_v44, 4  ;;  %v3037_v29 = vcombine.low %v2135_v15, %v2145_v41  ;;  %v2159_v35 = vsel %vm3604_vm4, %v2154_v40, %v4197_v25  ;;  %v2178_v0 = vrot.slane %v2177_v51, 4  ;;  %v3495_v51 = vld [vmem:[%s3565_s25 + $0x24] sm:$0xff]  }
  0x89   : > { %3295 = vmatmul.mubr.msk.bf16.vlgmr.msra.gmra.mrb[0].mxu0 %vm429_vm3, %v3034_v13  ;;  %v2169_v13 = vsel %vm3604_vm4, %v2164_v47, %v2168_v18  ;;  %v2192_v2 = vrot.slane %v2190_v49, 5  ;;  %v1329_v9 = vrot.slane %v1328_v58, 4  ;;  %v1333_v61 = vrot.slane %v1331_v23, 5 }
  0x8a   : > { %3311 = vmatpush3.bf16.msra.mxu0 %v2523_v37  ;;  %3298 = vmatprep.mubr.msk.bf16.mxu0 %vm429_vm3, %v3035_v34  ;;  %v2187_v37 = vor.u32 %v2186_v20, %v4215_v59  ;;  %v2418_v6 = vrot.slane %v4012_v31, 5  ;;  %v2201_v7 = vor.u32 %v2200_v62, %v2197_v48  ;;  %v2211_v33 = vor.u32 %v2210_v50, %v4248_v24  ;;  %v3049_v20 = vld [vmem:[%s3565_s25 + $0x18] sm:$0xe]  ;;  %v3051_v62 = vld [vmem:[%s3565_s25 + $0x30] sm:$0xe] }
  0x8b   : > { %3213 = vmatmul.mubr.msk.bf16.gmra.mrb[8].mxu1 %vm429_vm3, %v4449_v11  ;;  %v2214_v25 = vshll.u32 %v4254_v60, 16  ;;  %v4451_v53 = vcombine.low %v4093_v19, %v4105_v10  ;;  %v3038_v52 = vcombine.low %v2159_v35, %v2169_v13  ;;  %v2183_v31 = vsel %vm3604_vm4, %v2178_v0, %v4215_v59  ;;  %v3494_v59 = vld [vmem:[%s3565_s25 + $0x18] sm:$0xff]  }
  0x8c   : > { %3216 = vmatprep.mubr.msk.bf16.mxu1 %vm429_vm3, %v4450_v4  ;;  %v2188_v34 = vrot.slane %v2187_v37, 4  ;;  %v1312_v26 = vshrl.u32 %v2916_v22, 16  ;;  %v1315_v55 = vshll.u32 %v2916_v22, 16  ;;  %v3057_v19 = vrot.slane %v3049_v20, 9  ;;  %v2913_v4 = vld [vmem:[%s3565_s25 + $0x3c] sm:$0xf] }
  0x8d   : > { %v2420_v10 = vrot.slane %v2418_v6, 4  ;;  %v2421_v38 = vrot.slane %v4046_v30, 5  ;;  %v1334_v44 = vsel %vm3604_vm4, %v1329_v9, %v1333_v61  ;;  %v2202_v11 = vrot.slane %v2201_v7, 4  ;;  %v3050_v30 = vld [vmem:[%s3565_s25 + $0x24] sm:$0xe]  ;;  %v3496_v22 = vld [vmem:[%s3565_s25 + $0x30] sm:$0xff]  }
  0x8e   : > { %v2193_v39 = vsel %vm3604_vm4, %v2188_v34, %v2192_v2  ;;  %v2212_v15 = vrot.slane %v2211_v33, 4  ;;  %v2216_v41 = vrot.slane %v2214_v25, 5  ;;  %v1314_v40 = vrot.slane %v1312_v26, 4  ;;  %v3497_v20 = vld [vmem:[%s3565_s25 + $0x3c] sm:$0xff]   ;;  %v2919_v26 = vld [vmem:[%s3565_s25 + $0x54] sm:$0xf] }
  0x8f   : > { %v3039_v18 = vcombine.low %v2183_v31, %v2193_v39  ;;  %v1317_v47 = vrot.slane %v1315_v55, 5  ;;  %v2419_v37 = vsel %vm3759_vm7, %v3057_v19, %v2418_v6  ;;  %v2422_v49 = vsel %vm3759_vm7, %v2420_v10, %v2421_v38  ;;  %v3053_v38 = vld [vmem:[%s3565_s25 + $0x48] sm:$0xe] }
  0x90   : > { %v2425_v58 = vrot.slane %v4059_v14, 5  ;;  %v2217_v48 = vsel %vm3604_vm4, %v2212_v15, %v2216_v41  ;;  %v2432_v50 = vrot.slane %v4078_v8, 5  ;;  %v1291_v35 = vshll.u32 %v2913_v4, 16 }
  0x91   : > { %3299 = vmatmul.mubr.msk.bf16.gmra.mrb[4].mxu0 %vm429_vm3, %v3036_v54  ;;  %v1318_v23 = vor.u32 %v1317_v47, %v1314_v40  ;;  %v2207_v54 = vsel %vm3604_vm4, %v2202_v11, %v4248_v24  ;;  %v1297_v14 = vshll.u32 %v3862_v42, 16  ;;  %v3058_v24 = vrot.slane %v3050_v30, 9 }
  0x92   : > { %3302 = vmatprep.mubr.msk.bf16.mxu0 %vm429_vm3, %v3037_v29  ;;  %v1288_v29 = vshrl.u32 %v2913_v4, 16  ;;  %v2428_v8 = vrot.slane %v4101_v36, 5  ;;  %v3066_v0 = vcombine.low %v2419_v37, %v2422_v49  ;;  %v2427_v34 = vrot.slane %v2425_v58, 4  ;;  %v3498_v37 = vld [vmem:[%s3565_s25 + $0x48] sm:$0xff]  }
  0x93   : > { %3217 = vmatmul.mubr.msk.bf16.gmra.mrb[12].mxu1 %vm429_vm3, %v4451_v53  ;;  %v1319_v13 = vrot.slane %v1318_v23, 4  ;;  %v3059_v2 = vrot.slane %v3051_v62, 9  ;;  %v3040_v61 = vcombine.low %v2207_v54, %v2217_v48  ;;  %v2434_v6 = vrot.slane %v2432_v50, 4  ;;  %v3499_v23 = vld [vmem:[%s3565_s25 + $0x54] sm:$0xff]  }
  0x94   : > { %3222 = vmatprep.mubr.msk.bf16.mxu1 %vm429_vm3, %v3493_v1  ;;  %v1301_v1 = vshrl.u32 %v3862_v42, 16  ;;  %v2435_v42 = vrot.slane %v4108_v21, 5  ;;  %v1290_v7 = vrot.slane %v1288_v29, 4  ;;  %v1293_v33 = vrot.slane %v1291_v35, 5 }
  0x95   : > { %v1324_v9 = vsel %vm3604_vm4, %v1319_v13, %v4217_v57  ;;  %v4310_v25 = vrot.slane %v1297_v14, 5  ;;  %v2426_v53 = vsel %vm3759_vm7, %v3058_v24, %v2425_v58  ;;  %v2429_v57 = vsel %vm3759_vm7, %v2427_v34, %v2428_v8  ;;  %v3054_v24 = vld [vmem:[%s3565_s25 + $0x54] sm:$0xe]  ;;  %v4452_v8 = vld [vmem:[#allocation5_spill] sm:$0xff] }
  0x96   : > { %v1303_v36 = vrot.slane %v1301_v1, 4  ;;  %v2433_v21 = vsel %vm3759_vm7, %v3059_v2, %v2432_v50  ;;  %v2439_v31 = vrot.slane %v4119_v43, 5  ;;  %v1307_v39 = vshll.u32 %v3865_v45, 16  ;;  %v2922_v50 = vld [vmem:[%s3565_s25 + $0x60] sm:$0xf] }
  0x97   : > { %v2436_v55 = vsel %vm3759_vm7, %v2434_v6, %v2435_v42  ;;  %v1294_v19 = vor.u32 %v1293_v33, %v1290_v7  ;;  %v3067_v43 = vcombine.low %v2426_v53, %v2429_v57  ;;  %v2442_v11 = vrot.slane %v4161_v46, 5  ;;  %v4454_v33 = vld [vmem:[#allocation2_spill] sm:$0xff] }
  0x98   : > { %v1304_v10 = vor.u32 %v1303_v36, %v4310_v25  ;;  %v1336_v15 = vshrl.u32 %v2919_v26, 16  ;;  %v1339_v41 = vshll.u32 %v2919_v26, 16  ;;  %v1345_v40 = vshll.u32 %v3891_v17, 16 }
  0x99   : > { %3303 = vmatmul.mubr.msk.bf16.gmra.mrb[8].mxu0 %vm429_vm3, %v3038_v52  ;;  %v3052_v52 = vld [vmem:[%s3565_s25 + $0x3c] sm:$0xe]  ;;  %v2441_v4 = vrot.slane %v2439_v31, 4  ;;  %v1309_v47 = vrot.slane %v1307_v39, 5  ;;  %v2449_v58 = vrot.slane %v4166_v63, 5  ;;  %v2453_v63 = vrot.slane %v4151_v27, 5 }
  0x9a   : > { %3306 = vmatprep.mubr.msk.bf16.mxu0 %vm429_vm3, %v3039_v18  ;;  %v3060_v45 = vrot.slane %v3052_v52, 9  ;;  %v3068_v18 = vcombine.low %v2433_v21, %v2436_v55  ;;  %v1305_v49 = vrot.slane %v1304_v10, 4  ;;  %v1338_v46 = vrot.slane %v1336_v15, 4  ;;  %v3055_v27 = vld [vmem:[%s3565_s25 + $0x60] sm:$0xe] }
  0x9b   : > { %3223 = vmatmul.mubr.msk.bf16.vlgmr.msra.gmra.mrb[0].mxu1 %vm429_vm3, %v3494_v59  ;;  %v1349_v59 = vshrl.u32 %v3891_v17, 16  ;;  %v1341_v54 = vrot.slane %v1339_v41, 5  ;;  %v1347_v48 = vrot.slane %v1345_v40, 5  ;;  %v2443_v29 = vsel %vm3759_vm7, %v2441_v4, %v2442_v11  ;;  %v3500_v52 = vld [vmem:[%s3565_s25 + $0x60] sm:$0xff]  }
  0x9c   : > { %3329 = vmatpush3.bf16.msra.mxu1 %v3548_v3  ;;  %3226 = vmatprep.mubr.msk.bf16.mxu1 %vm429_vm3, %v3495_v51  ;;  %v4307_v3 = vcombine.low %v1324_v9, %v1334_v44  ;;  %v2446_v44 = vrot.slane %v4130_v16, 5  ;;  %v3061_v51 = vrot.slane %v3053_v38, 9  ;;  %v1295_v16 = vrot.slane %v1294_v19, 4  ;;  %v4453_v9 = vld [vmem:[#allocation3_spill] sm:$0xff] }
  0x9d   : > { %v1351_v62 = vrot.slane %v1349_v59, 4  ;;  %v2440_v17 = vsel %vm3759_vm7, %v3060_v45, %v2439_v31  ;;  %v1310_v1 = vsel %vm3604_vm4, %v1305_v49, %v1309_v47  ;;  %v1360_v34 = vshrl.u32 %v2922_v50, 16  ;;  %v3056_v47 = vld [vmem:[%s3565_s25 + $0x6c] sm:$0xe] }
  0x9e   : > { %v2448_v30 = vrot.slane %v2446_v44, 4  ;;  %v2447_v35 = vsel %vm3759_vm7, %v3061_v51, %v2446_v44  ;;  %v1300_v14 = vsel %vm3604_vm4, %v1295_v16, %v4310_v25  ;;  %v1363_v2 = vshll.u32 %v2922_v50, 16 }
  0x9f   : > { %v1373_v6 = vshrl.u32 %v4453_v9, 16  ;;  %v3069_v42 = vcombine.low %v2440_v17, %v2443_v29  ;;  %v1352_v7 = vor.u32 %v1351_v62, %v1347_v48  ;;  %v1355_v25 = vshll.u32 %v4454_v33, 16 }
  0xa0   : > { %v2450_v13 = vsel %vm3759_vm7, %v2448_v30, %v2449_v58  ;;  %v2455_v53 = vrot.slane %v2453_v63, 4  ;;  %v2456_v57 = vrot.slane %v4204_v56, 5  ;;  %v2930_v21 = vcombine.low %v1300_v14, %v1310_v1 }
  0xa1   : > { %3307 = vmatmul.mubr.msk.bf16.gmra.mrb[12].mxu0 %vm429_vm3, %v3040_v61  ;;  %v1369_v61 = vshll.u32 %v4453_v9, 16  ;;  %v3070_v36 = vcombine.low %v2447_v35, %v2450_v13  ;;  %v3063_v31 = vrot.slane %v3055_v27, 9  ;;  %v2463_v26 = vrot.slane %v4225_v28, 5 }
  0xa2   : > { %3312 = vmatprep.mubr.msk.bf16.mxu0 %vm429_vm3, %v3066_v0  ;;  %v2460_v0 = vrot.slane %v4452_v8, 5  ;;  %v1362_v55 = vrot.slane %v1360_v34, 4  ;;  %v1365_v19 = vrot.slane %v1363_v2, 5  ;;  %v1375_v38 = vrot.slane %v1373_v6, 4 }
  0xa3   : > { %3227 = vmatmul.mubr.msk.bf16.gmra.mrb[4].mxu1 %vm429_vm3, %v3496_v22  ;;  %v1342_v22 = vor.u32 %v1341_v54, %v1338_v46  ;;  %v1371_v10 = vrot.slane %v1369_v61, 5  ;;  %v1357_v45 = vrot.slane %v1355_v25, 5  ;;  %v2457_v28 = vsel %vm3759_vm7, %v2455_v53, %v2456_v57 }
  0xa4   : > { %3230 = vmatprep.mubr.msk.bf16.mxu1 %vm429_vm3, %v3497_v20  ;;  %v3062_v20 = vrot.slane %v3054_v24, 9  ;;  %v2462_v39 = vrot.slane %v2460_v0, 4  ;;  %v2461_v11 = vsel %vm3759_vm7, %v3063_v31, %v2460_v0  ;;  %v2467_v15 = vrot.slane %v4213_v12, 5 }
  0xa5   : > { %v1343_v44 = vrot.slane %v1342_v22, 4  ;;  %v1366_v40 = vor.u32 %v1365_v19, %v1362_v55  ;;  %v1376_v59 = vor.u32 %v1375_v38, %v1371_v10  ;;  %v3064_v30 = vrot.slane %v3056_v47, 9 }
  0xa6   : > { %v2454_v56 = vsel %vm3759_vm7, %v3062_v20, %v2453_v63  ;;  %v2464_v41 = vsel %vm3759_vm7, %v2462_v39, %v2463_v26  ;;  %v2469_v12 = vrot.slane %v2467_v15, 4  ;;  %v2470_v58 = vrot.slane %v4254_v60, 5 }
  0xa7   : > { %v1348_v51 = vsel %vm3604_vm4, %v1343_v44, %v1347_v48  ;;  %v3071_v16 = vcombine.low %v2454_v56, %v2457_v28  ;;  %v3072_v49 = vcombine.low %v2461_v11, %v2464_v41  ;;  %v1367_v46 = vrot.slane %v1366_v40, 4 }
  0xa8   : > { %v1377_v54 = vrot.slane %v1376_v59, 4  ;;  %v2468_v48 = vsel %vm3759_vm7, %v3064_v30, %v2467_v15  ;;  %v2471_v50 = vsel %vm3759_vm7, %v2469_v12, %v2470_v58 }
  0xa9   : > { %3313 = vmatmul.mubr.msk.bf16.vlgmr.msra.gmra.mrb[0].mxu0 %vm429_vm3, %v3067_v43  ;;  %v1353_v43 = vrot.slane %v1352_v7, 4  ;;  %v1372_v60 = vsel %vm3604_vm4, %v1367_v46, %v1371_v10  ;;  %v3073_v29 = vcombine.low %v2468_v48, %v2471_v50 }
  0xaa   : > { %3316 = vmatprep.mubr.msk.bf16.mxu0 %vm429_vm3, %v3068_v18  ;;  %v4455_v18 = vld [vmem:[#allocation4_spill] sm:$0xff] }
  0xab   : > { %3231 = vmatmul.mubr.msk.bf16.gmra.mrb[8].mxu1 %vm429_vm3, %v3498_v37  ;;  %v1379_v4 = vshll.u32 %v4455_v18, 16  ;;  %v1358_v37 = vsel %vm3604_vm4, %v1353_v43, %v1357_v45 }
  0xac   : > { %3234 = vmatprep.mubr.msk.bf16.mxu1 %vm429_vm3, %v3499_v23  ;;  %v2932_v23 = vcombine.low %v1348_v51, %v1358_v37 }
  0xad   : > { %v1381_v62 = vrot.slane %v1379_v4, 5 }
  0xaf   : > { %v1382_v17 = vsel %vm3604_vm4, %v1377_v54, %v1381_v62 }
  0xb0   : > { %v2933_v35 = vcombine.low %v1372_v60, %v1382_v17 }
  0xb1   : > { %3317 = vmatmul.mubr.msk.bf16.gmra.mrb[4].mxu0 %vm429_vm3, %v3069_v42 }
  0xb2   : > { %3320 = vmatprep.mubr.msk.bf16.mxu0 %vm429_vm3, %v3070_v36 }
  0xb3   : > { %3235 = vmatmul.mubr.msk.bf16.gmra.mrb[12].mxu1 %vm429_vm3, %v3500_v52 }
  0xb4   : > { %3248 = vmatprep.mubr.msk.bf16.mxu1 %vm429_vm3, %v2930_v21 }
  0xb9   : > { %3321 = vmatmul.mubr.msk.bf16.gmra.mrb[8].mxu0 %vm429_vm3, %v3071_v16 }
  0xba   : > { %3324 = vmatprep.mubr.msk.bf16.mxu0 %vm429_vm3, %v3072_v49 }
  0xbb   : > { %3249 = vmatmul.mubr.msk.bf16.vlgmr.msra.gmra.mrb[8].mxu1 %vm429_vm3, %v4307_v3 }
  0xbc   : > { %3252 = vmatprep.mubr.msk.bf16.mxu1 %vm429_vm3, %v2932_v23 }
  0xc1   : > { %3325 = vmatmul.mubr.msk.bf16.gmra.mrb[12].mxu0 %vm429_vm3, %v3073_v29 }
  0xc3   : > { %3253 = vmatmul.mubr.msk.bf16.gmra.mrb[12].mxu1 %vm429_vm3, %v2933_v35 }
 0x16e   : > { %v3224_v3 = vpop.f32.mrb[0].mxu1 }
 0x16f   : > { %v1088_v63 = vpop.f32.mrb[1].mxu1 }
 0x170   : > { %v3225_v14 = vpop.f32.mrb[2].mxu1 }
 0x171   : > { %v1091_v5 = vpop.f32.mrb[3].mxu1 }
 0x176   : > { %v3228_v1 = vpop.f32.mrb[4].mxu1 }
 0x177   : > { %v1104_v13 = vpop.f32.mrb[5].mxu1 }
 0x178   : > { %v3229_v24 = vpop.f32.mrb[6].mxu1 }
 0x179   : > { %v1107_v8 = vpop.f32.mrb[7].mxu1 }
 0x17c   : > { %v3314_v32 = vpop.f32.mrb[0].mxu0 }
 0x17d   : > { %v3330_v0 = vadd.f32 %v3314_v32, %v3224_v3  ;;  %v2559_v27 = vpop.f32.mrb[1].mxu0 }
 0x17e   : > { %v3331_v34 = vadd.f32 %v2559_v27, %v1088_v63  ;;  %v3315_v2 = vpop.f32.mrb[2].mxu0 }
 0x17f   : > { %2640 = vst [vmem:[%s4405_s16 + $0x10] sm:$0xff] %v3330_v0  ;;  %v3332_v9 = vadd.f32 %v3315_v2, %v3225_v14  ;;  %v2562_v61 = vpop.f32.mrb[3].mxu0  ;;  %v2677_v33 = vmul.f32 %v3330_v0, %v3330_v0 }
 0x180   : > { %2638 = vst [vmem:[%s4405_s16] sm:$0xff] %v3331_v34  ;;  %v3333_v6 = vadd.f32 %v2562_v61, %v1091_v5  ;;  %v2675_v42 = vmul.f32 %v3331_v34, %v3331_v34 }
 0x181   : > { %2641 = vst [vmem:[%s4405_s16 + $0x18] sm:$0xff] %v3332_v9  ;;  %v2678_v52 = vmul.f32 %v3332_v9, %v3332_v9 }
 0x182   : > { %2639 = vst [vmem:[%s4405_s16 + $0x8] sm:$0xff] %v3333_v6  ;;  %v2654_v22 = vadd.f32 %v3333_v6, %v3331_v34  ;;  %v2676_v7 = vmul.f32 %v3333_v6, %v3333_v6 }
 0x184   : > { %v2655_v25 = vadd.f32 %v3330_v0, %v2654_v22  ;;  %v2691_v36 = vadd.f32 %v2676_v7, %v2675_v42  ;;  %v3318_v20 = vpop.f32.mrb[4].mxu0 }
 0x185   : > { %v3334_v53 = vadd.f32 %v3318_v20, %v3228_v1  ;;  %v2575_v57 = vpop.f32.mrb[5].mxu0 }
 0x186   : > { %v2692_v21 = vadd.f32 %v2691_v36, %v2677_v33  ;;  %v3335_v31 = vadd.f32 %v2575_v57, %v1104_v13  ;;  %v2656_v39 = vadd.f32 %v3332_v9, %v2655_v25  ;;  %v3319_v26 = vpop.f32.mrb[6].mxu0 }
 0x187   : > { %2644 = vst [vmem:[%s4405_s16 + $0x30] sm:$0xff] %v3334_v53  ;;  %v3336_v55 = vadd.f32 %v3319_v26, %v3229_v24  ;;  %v2578_v19 = vpop.f32.mrb[7].mxu0  ;;  %v2681_v11 = vmul.f32 %v3334_v53, %v3334_v53 }
 0x188   : > { %2642 = vst [vmem:[%s4405_s16 + $0x20] sm:$0xff] %v3335_v31  ;;  %v2657_v10 = vadd.f32 %v3335_v31, %v2656_v39  ;;  %v2679_v38 = vmul.f32 %v3335_v31, %v3335_v31  ;;  %v2693_v44 = vadd.f32 %v2692_v21, %v2678_v52  ;;  %v3337_v43 = vadd.f32 %v2578_v19, %v1107_v8 }
 0x189   : > { %2645 = vst [vmem:[%s4405_s16 + $0x38] sm:$0xff] %v3336_v55  ;;  %v2682_v4 = vmul.f32 %v3336_v55, %v3336_v55 }
 0x18a   : > { %v2694_v45 = vadd.f32 %v2693_v44, %v2679_v38  ;;  %2643 = vst [vmem:[%s4405_s16 + $0x28] sm:$0xff] %v3337_v43  ;;  %v2658_v56 = vadd.f32 %v3337_v43, %v2657_v10  ;;  %v2680_v28 = vmul.f32 %v3337_v43, %v3337_v43 }
 0x18c   : > { %v2659_v15 = vadd.f32 %v3334_v53, %v2658_v56  ;;  %v2695_v41 = vadd.f32 %v2694_v45, %v2680_v28  ;;  %v3322_v40 = vpop.f32.mrb[8].mxu0 }
 0x18d   : > { %v2591_v18 = vpop.f32.mrb[9].mxu0 }
 0x18e   : > { %v3250_v59 = vpop.f32.mrb[8].mxu1  ;;  %v2696_v47 = vadd.f32 %v2695_v41, %v2681_v11  ;;  %v2660_v16 = vadd.f32 %v3336_v55, %v2659_v15  ;;  %v3323_v49 = vpop.f32.mrb[10].mxu0 }
 0x18f   : > { %v3338_v51 = vadd.f32 %v3322_v40, %v3250_v59  ;;  %v1502_v37 = vpop.f32.mrb[9].mxu1  ;;  %v2594_v58 = vpop.f32.mrb[11].mxu0 }
 0x190   : > { %v3339_v30 = vadd.f32 %v2591_v18, %v1502_v37  ;;  %v3251_v12 = vpop.f32.mrb[10].mxu1  ;;  %v2697_v23 = vadd.f32 %v2696_v47, %v2682_v4 }
 0x191   : > { %2648 = vst [vmem:[%s4405_s16 + $0x50] sm:$0xff] %v3338_v51  ;;  %v3340_v46 = vadd.f32 %v3323_v49, %v3251_v12  ;;  %v1505_v54 = vpop.f32.mrb[11].mxu1  ;;  %v2685_v3 = vmul.f32 %v3338_v51, %v3338_v51 }
 0x192   : > { %2646 = vst [vmem:[%s4405_s16 + $0x40] sm:$0xff] %v3339_v30  ;;  %v2661_v62 = vadd.f32 %v3339_v30, %v2660_v16  ;;  %v2683_v48 = vmul.f32 %v3339_v30, %v3339_v30  ;;  %v3341_v50 = vadd.f32 %v2594_v58, %v1505_v54 }
 0x193   : > { %2649 = vst [vmem:[%s4405_s16 + $0x58] sm:$0xff] %v3340_v46  ;;  %v2686_v32 = vmul.f32 %v3340_v46, %v3340_v46 }
 0x194   : > { %v2698_v60 = vadd.f32 %v2697_v23, %v2683_v48  ;;  %2647 = vst [vmem:[%s4405_s16 + $0x48] sm:$0xff] %v3341_v50  ;;  %v2662_v17 = vadd.f32 %v3341_v50, %v2661_v62  ;;  %v2684_v29 = vmul.f32 %v3341_v50, %v3341_v50  ;;  %v3326_v35 = vpop.f32.mrb[12].mxu0 }
 0x195   : > { %v2607_v1 = vpop.f32.mrb[13].mxu0 }
 0x196   : > { %v2663_v63 = vadd.f32 %v3338_v51, %v2662_v17  ;;  %v2699_v14 = vadd.f32 %v2698_v60, %v2684_v29  ;;  %v3254_v5 = vpop.f32.mrb[12].mxu1  ;;  %v3327_v8 = vpop.f32.mrb[14].mxu0 }
 0x197   : > { %v3342_v13 = vadd.f32 %v3326_v35, %v3254_v5  ;;  %v1518_v24 = vpop.f32.mrb[13].mxu1  ;;  %v2610_v9 = vpop.f32.mrb[15].mxu0 }
 0x198   : > { %v2700_v0 = vadd.f32 %v2699_v14, %v2685_v3  ;;  %v3343_v27 = vadd.f32 %v2607_v1, %v1518_v24  ;;  %v2664_v34 = vadd.f32 %v3340_v46, %v2663_v63  ;;  %v3255_v2 = vpop.f32.mrb[14].mxu1 }
 0x199   : > { %2652 = vst [vmem:[%s4405_s16 + $0x70] sm:$0xff] %v3342_v13  ;;  %v3344_v61 = vadd.f32 %v3327_v8, %v3255_v2  ;;  %v1521_v6 = vpop.f32.mrb[15].mxu1  ;;  %v2689_v53 = vmul.f32 %v3342_v13, %v3342_v13 }
 0x19a   : > { %2650 = vst [vmem:[%s4405_s16 + $0x60] sm:$0xff] %v3343_v27  ;;  %v2665_v42 = vadd.f32 %v3343_v27, %v2664_v34  ;;  %v2687_v22 = vmul.f32 %v3343_v27, %v3343_v27  ;;  %v2701_v7 = vadd.f32 %v2700_v0, %v2686_v32  ;;  %v3345_v33 = vadd.f32 %v2610_v9, %v1521_v6 }
 0x19b   : > { %2653 = vst [vmem:[%s4405_s16 + $0x78] sm:$0xff] %v3344_v61  ;;  %v2690_v21 = vmul.f32 %v3344_v61, %v3344_v61 }
 0x19c   : > { %v2702_v25 = vadd.f32 %v2701_v7, %v2687_v22  ;;  %2651 = vst [vmem:[%s4405_s16 + $0x68] sm:$0xff] %v3345_v33  ;;  %v2666_v36 = vadd.f32 %v3345_v33, %v2665_v42  ;;  %v2688_v20 = vmul.f32 %v3345_v33, %v3345_v33 }
 0x19e   : > { %v2667_v57 = vadd.f32 %v3342_v13, %v2666_v36  ;;  %v2703_v52 = vadd.f32 %v2702_v25, %v2688_v20 }
 0x1a0   : > { %v2668_v31 = vadd.f32 %v3344_v61, %v2667_v57  ;;  %v2704_v39 = vadd.f32 %v2703_v52, %v2689_v53 }
 0x1a2   : > { %v2669_v26 = vrot.slane %v2668_v31, 4  ;;  %v2705_v55 = vadd.f32 %v2704_v39, %v2690_v21 }
 0x1a4   : > { %v2670_v19 = vadd.f32 %v2669_v26, %v2668_v31  ;;  %v2706_v10 = vrot.slane %v2705_v55, 4 }
 0x1a6   : > { %v2671_v38 = vrot.slane %v2670_v19, 2  ;;  %v2707_v44 = vadd.f32 %v2706_v10, %v2705_v55 }
 0x1a8   : > { %v2672_v43 = vadd.f32 %v2671_v38, %v2670_v19  ;;  %v2708_v45 = vrot.slane %v2707_v44, 2 }
 0x1aa   : > { %v2673_v56 = vrot.slane %v2672_v43, 1  ;;  %v2709_v28 = vadd.f32 %v2708_v45, %v2707_v44 }
 0x1ac   : > { %v2710_v11 = vrot.slane %v2709_v28, 1  ;;  %v2674_v15 = vadd.f32 %v2673_v56, %v2672_v43 }
 0x1ae   : > { %v2711_v41 = vadd.f32 %v2710_v11, %v2709_v28 }
 0x1b0   : > { %v2713_v40 = vsel %vm2712_vm8, %v2674_v15, %v2711_v41 }
 0x1b1   : > { %2714 = vst [vmem:[%s181_s20] sm:$0x3] %v2713_v40 }
 0x1b2 PF: > { %s14_s12 = sadd.s32 1, %s3508_s12  }
 0x1b3   : > { %p11_p4 = scmp.ge.s32.totalorder %s14_s12, 6  }
 0x1b5   :  { %13 = sbr.rel (!%p11_p4) target bundleno = 1 (0x1), region = 80 }

</bundles_post_ra>
